<compile_context>
chip_gen: v5e
topology: v5e:2x2
jax: 0.10.0
libtpu: 0.0.40
codegen_flags: <defaults>
</compile_context>

<pallas_src>
import numpy as np
import jax
import jax.numpy as jnp
from jax import lax
from jax.experimental import pallas as pl
from jax.experimental.pallas import tpu as pltpu

# ---------------- DFT-D3 constants (zero damping, "pbe" defaults) ----------------
BOHR = 0.52917721067
D3_K1 = 16.0
D3_K3 = -4.0
CUTOFF = 95.0 * BOHR          # angstrom (module default)
CNTHR = 40.0 * BOHR           # angstrom (module default)
RS6 = 1.217
S18 = 0.722
RS18 = 1.0
S6 = 1.0
ALP6 = 14                     # alp
ALP8 = 16                     # alp + 2
MAXZ = 95
NREF = 25                     # 5 x 5 coordination-number reference pairs

# dot_general contracting the lane (edge) axis of both operands: (rows,E)x(N,E)->(rows,N)
_DOT_T = (((1,), (1,)), ((), ()))


def _edge_geometry(geom):
    """Unpack the (8, E) packed per-edge slab and compute r, 1/r."""
    dvec = geom[0:3, :]
    rcov = geom[3:4, :]
    r0 = geom[4:5, :]
    rr = geom[5:6, :]
    valid = geom[6:7, :]
    r2 = jnp.sum(dvec * dvec, axis=0, keepdims=True)
    r2 = jnp.where(valid > 0.0, r2, 1.0)       # guard padded edges (dvec == 0)
    r = jnp.sqrt(r2)
    inv_r = 1.0 / r
    return dvec, rcov, r0, rr, valid, r, inv_r


def _one_hot(idx_row, n_pad, e_blk):
    """(N_pad, E_blk) one-hot built in-kernel from an int32 (1, E_blk) index row."""
    atom_ids = lax.broadcasted_iota(jnp.int32, (n_pad, e_blk), 0)
    return (atom_ids == idx_row).astype(jnp.float32)


# ---------------- Single fused kernel: grid = (phase, edge block) ----------------
def _d3_kernel(geom_ref, cn0_ref, cni_ref, cnj_ref, idx_ref,
               cn_ref, energy_ref, force_ref, dcn_ref):
    f32 = jnp.float32
    phase = pl.program_id(0)
    blk = pl.program_id(1)

    @pl.when((phase == 0) & (blk == 0))
    def _init():
        cn_ref[...] = jnp.zeros_like(cn_ref)
        energy_ref[...] = jnp.zeros_like(energy_ref)
        force_ref[...] = jnp.zeros_like(force_ref)
        dcn_ref[...] = jnp.zeros_like(dcn_ref)

    geom = geom_ref[...]
    dvec, rcov, r0, rr, valid, r, inv_r = _edge_geometry(geom)
    n_pad = cn_ref.shape[1]
    e_blk = geom.shape[1]
    oh_i = _one_hot(idx_ref[0:1, :], n_pad, e_blk)                   # (N, E)

    # ---- Phase 0: coordination numbers (scatter onto atoms) ----
    @pl.when(phase == 0)
    def _cn_pass():
        cn_mask = jnp.where((r <= CNTHR) & (valid > 0.0), 1.0, 0.0).astype(f32)
        p = cn_mask / (1.0 + jnp.exp(-D3_K1 * (rcov * inv_r - 1.0)))  # (1, E)
        cn_ref[...] += lax.dot_general(p, oh_i, _DOT_T, preferred_element_type=f32)

    # ---- Phase 1: energy + direct forces + per-atom dE/dCN ----
    @pl.when(phase == 1)
    def _energy_pass():
        oh_j = _one_hot(idx_ref[1:2, :], n_pad, e_blk)

        # gather per-edge coordination numbers from the resident per-atom CN row
        cn_row = cn_ref[...]                                          # (1, N)
        cn_i = jnp.dot(cn_row, oh_i, preferred_element_type=f32)      # (1, E)
        cn_j = jnp.dot(cn_row, oh_j, preferred_element_type=f32)

        # C6 interpolation over 25 reference CN pairs. logits = K3*q <= 0, so no
        # max-subtraction is needed; guard the denominator for all-invalid columns.
        cn0 = cn0_ref[...]                                            # (25, E)
        ci = cni_ref[...]
        cj = cnj_ref[...]
        q = (ci - cn_i) ** 2 + (cj - cn_j) ** 2
        w = jnp.where(cn0 > 0.0, jnp.exp(D3_K3 * q), 0.0)
        z = jnp.sum(w, axis=0, keepdims=True)
        inv_z = 1.0 / jnp.where(z > 0.0, z, 1.0)
        wn = w * inv_z
        c6 = jnp.sum(wn * cn0, axis=0, keepdims=True)                 # (1, E)
        c8 = 3.0 * c6 * rr

        # shared power chains
        inv_r2 = inv_r * inv_r
        inv_r6 = inv_r2 * inv_r2 * inv_r2
        inv_r8 = inv_r6 * inv_r2
        u = r0 * inv_r
        u2 = u * u
        u4 = u2 * u2
        u8 = u4 * u4
        t6 = (RS6 ** ALP6) * (u8 * u4 * u2)          # (rs6*r0/r)^14
        t8 = (RS18 ** ALP8) * (u8 * u8)              # (rs18*r0/r)^16
        damp6 = 1.0 / (1.0 + 6.0 * t6)
        damp8 = 1.0 / (1.0 + 6.0 * t8)
        emask = jnp.where((r <= CUTOFF) & (valid > 0.0), 1.0, 0.0).astype(f32)

        # zero-damping dispersion energy (0.5 factor for bidirectional edges)
        e6 = (-0.5 * S6) * c6 * damp6 * inv_r6
        e8 = (-0.5 * S18) * c8 * damp8 * inv_r8
        energy_ref[...] += jnp.sum((e6 + e8) * emask)

        # analytic derivatives
        de6_dr = (-0.5 * S6) * c6 * damp6 * (6.0 * ALP6 * t6 * damp6 - 6.0) * inv_r6 * inv_r
        de8_dr = (-0.5 * S18) * c8 * damp8 * (6.0 * ALP8 * t8 * damp8 - 8.0) * inv_r8 * inv_r
        de_dr = (de6_dr + de8_dr) * emask
        de_dc6 = ((-0.5 * S6) * damp6 * inv_r6 - (1.5 * S18) * rr * damp8 * inv_r8) * emask

        dc6_dz = wn * (cn0 - c6)
        gi = de_dc6 * jnp.sum(dc6_dz * (2.0 * D3_K3) * (cn_i - ci), axis=0, keepdims=True)
        gj = de_dc6 * jnp.sum(dc6_dz * (2.0 * D3_K3) * (cn_j - cj), axis=0, keepdims=True)

        # batch the skinny scatters: [direct force ; dE/dCN weight] per endpoint
        wvec = dvec * (inv_r * de_dr)                                 # (3, E)
        lhs_i = jnp.concatenate([wvec, gi], axis=0)                   # (4, E)
        lhs_j = jnp.concatenate([wvec, gj], axis=0)
        r_i = lax.dot_general(lhs_i, oh_i, _DOT_T, preferred_element_type=f32)  # (4, N)
        r_j = lax.dot_general(lhs_j, oh_j, _DOT_T, preferred_element_type=f32)

        force_ref[...] += r_i[0:3, :] - r_j[0:3, :]   # direct force contribution
        dcn_ref[...] += r_i[3:4, :] + r_j[3:4, :]     # per-atom dE/dCN contribution

    # ---- Phase 2: coordination-number chain-rule force contribution ----
    @pl.when(phase == 2)
    def _chain_pass():
        oh_j = _one_hot(idx_ref[1:2, :], n_pad, e_blk)
        cn_mask = jnp.where((r <= CNTHR) & (valid > 0.0), 1.0, 0.0).astype(f32)
        p = cn_mask / (1.0 + jnp.exp(-D3_K1 * (rcov * inv_r - 1.0)))
        dp_dr = p * (1.0 - p) * D3_K1 * (-rcov * inv_r * inv_r)       # 0 on padded/masked edges

        dcn_src = jnp.dot(dcn_ref[...], oh_i, preferred_element_type=f32)  # (1, E) dE/dCN at i
        wvec = dvec * (inv_r * (dcn_src * dp_dr))                          # (3, E)
        r_i = lax.dot_general(wvec, oh_i, _DOT_T, preferred_element_type=f32)  # (3, N)
        r_j = lax.dot_general(wvec, oh_j, _DOT_T, preferred_element_type=f32)
        force_ref[...] += r_i - r_j


def dftd3_pallas(pos, Z, cell, pbc, edge_index, unit_shifts, tables, edge_block=2048):
    """Mirrors TorchDFTD3TorchCalculator.forward for the two-body D3(zero) term."""
    rcov_t, r2r4_t, r0ab_t, c6ab_t = tables
    n_atoms = int(pos.shape[0])
    idx_i_np = np.asarray(edge_index[0])
    idx_j_np = np.asarray(edge_index[1])
    n_edges = int(idx_i_np.shape[0])

    # lane-dense atom padding and 128-aligned edge blocks
    n_pad = max(128, ((n_atoms + 127) // 128) * 128)
    e_blk = max(128, min(int(edge_block), ((n_edges + 127) // 128) * 128))
    e_blk = ((e_blk + 127) // 128) * 128
    e_pad = ((n_edges + e_blk - 1) // e_blk) * e_blk
    nb = e_pad // e_blk

    # shift_pos = S @ cell if any(pbc) else S
    if bool(np.any(np.asarray(pbc))):
        shift_pos = jnp.asarray(unit_shifts, jnp.float32) @ jnp.asarray(cell, jnp.float32)
    else:
        shift_pos = jnp.asarray(unit_shifts, jnp.float32)

    pos = jnp.asarray(pos, jnp.float32)
    Z = jnp.asarray(Z, jnp.int32)
    ii = jnp.asarray(idx_i_np, jnp.int32)
    jj = jnp.asarray(idx_j_np, jnp.int32)

    # NOTE: the analytic force / CN chain assumes a *bidirectional* edge list
    # (each pair appears as (i, j) and (j, i)), matching the torch reference default.
    d = pos[jj] - pos[ii] + shift_pos                 # (E, 3)
    Zi, Zj = Z[ii], Z[jj]
    rcov_e = rcov_t[Zi] + rcov_t[Zj]
    r0_e = r0ab_t[Zi, Zj]
    rr_e = r2r4_t[Zi] * r2r4_t[Zj]
    c6ab_e = c6ab_t[Zi, Zj]                           # (E, 5, 5, 3)
    cn0_e = c6ab_e[..., 0].reshape(n_edges, NREF)
    cni_e = c6ab_e[..., 1].reshape(n_edges, NREF)
    cnj_e = c6ab_e[..., 2].reshape(n_edges, NREF)

    def pad_cols(x2d, fill, dtype):                   # (rows, E) -> (rows, e_pad)
        rows = x2d.shape[0]
        out = jnp.full((rows, e_pad), fill, dtype)
        return out.at[:, :n_edges].set(x2d.astype(dtype))

    # packed per-edge slab: dvec(3), rcov, r0, rr, valid, spare  -> (8, e_pad)
    geom = pad_cols(
        jnp.concatenate([d.T,
                         rcov_e[None, :], r0_e[None, :], rr_e[None, :],
                         jnp.ones((1, n_edges), jnp.float32),
                         jnp.zeros((1, n_edges), jnp.float32)], axis=0),
        0.0, jnp.float32)
    idx = pad_cols(jnp.stack([ii, jj], axis=0), 0, jnp.int32)          # (2, e_pad)
    cn0_p = pad_cols(cn0_e.T, -1.0, jnp.float32)      # padded refs marked invalid
    cni_p = pad_cols(cni_e.T, 0.0, jnp.float32)
    cnj_p = pad_cols(cnj_e.T, 0.0, jnp.float32)

    cp = pltpu.CompilerParams(dimension_semantics=("arbitrary", "arbitrary"),
                              vmem_limit_bytes=64 * 1024 * 1024)

    # Edge-streamed inputs sweep blocks on every phase; the 25-row reference
    # tables are only needed in phase 1, so they stay pinned to block 0 elsewhere
    # (Pallas skips re-DMA when the block index does not change).
    edge_spec8 = pl.BlockSpec((8, e_blk), lambda p, b: (0, b))
    edge_spec2 = pl.BlockSpec((2, e_blk), lambda p, b: (0, b))
    ref_spec25 = pl.BlockSpec((NREF, e_blk), lambda p, b: (0, jnp.where(p == 1, b, 0)))
    atom_spec1 = pl.BlockSpec((1, n_pad), lambda p, b: (0, 0))

    cn_atoms, energy_tile, force_acc, dcn_atoms = pl.pallas_call(
        _d3_kernel,
        out_shape=(jax.ShapeDtypeStruct((1, n_pad), jnp.float32),   # CN per atom
                   jax.ShapeDtypeStruct((1, 128), jnp.float32),     # energy (lane-broadcast)
                   jax.ShapeDtypeStruct((3, n_pad), jnp.float32),   # total forces (3, N)
                   jax.ShapeDtypeStruct((1, n_pad), jnp.float32)),  # dE/dCN per atom
        grid=(3, nb),
        in_specs=[edge_spec8, ref_spec25, ref_spec25, ref_spec25, edge_spec2],
        out_specs=(atom_spec1,
                   pl.BlockSpec((1, 128), lambda p, b: (0, 0)),
                   pl.BlockSpec((3, n_pad), lambda p, b: (0, 0)),
                   atom_spec1),
        compiler_params=cp,
    )(geom, cn0_p, cni_p, cnj_p, idx)

    energy = energy_tile[0, 0]
    forces = force_acc[:, :n_atoms].T                                  # (N, 3)
    # TODO(synk): stress/virial (PBC cell path), the ATM 3-body term (abc=True),
    #             cutoff_smoothing != "none", and the base-DFT free-energy
    #             addition are not implemented; non-PBC default returns zero stress.
    stress = jnp.zeros((3, 3), jnp.float32)
    del cn_atoms, dcn_atoms
    return {"energy": energy, "free_energy": energy, "forces": forces, "stress": stress}


def make_tables(key):
    """Deterministic synthetic DFT-D3 tables with the torch buffer shapes."""
    k1, k2, k3, k4, k5 = jax.random.split(key, 5)
    rcov = jax.random.uniform(k1, (MAXZ,), jnp.float32, 0.4, 1.6)
    r2r4 = jax.random.uniform(k2, (MAXZ,), jnp.float32, 2.0, 10.0)
    a = jax.random.uniform(k3, (MAXZ, MAXZ), jnp.float32, 1.0, 2.5)
    r0ab = 0.5 * (a + a.T) + 1.0                      # symmetric, (95, 95)
    cn0 = jax.random.uniform(k4, (MAXZ, MAXZ, 5, 5), jnp.float32, 1.0, 40.0)
    mi = jnp.arange(5)
    invalid = (mi[:, None] + mi[None, :]) >= 8        # mark the (4,4) reference invalid
    cn0 = jnp.where(invalid, -1.0, cn0)
    cnref = jax.random.uniform(k5, (MAXZ, MAXZ, 5, 5, 2), jnp.float32, 0.0, 6.0)
    c6ab = jnp.concatenate([cn0[..., None], cnref], axis=-1)   # (95, 95, 5, 5, 3)
    return rcov, r2r4, r0ab, c6ab


if __name__ == "__main__":
    key = jax.random.PRNGKey(0)
    k_tab, k_pos, k_z = jax.random.split(key, 3)
    tables = make_tables(k_tab)

    n_atoms = 24
    pos = jax.random.uniform(k_pos, (n_atoms, 3), jnp.float32, 0.0, 8.0)
    Z = jax.random.randint(k_z, (n_atoms,), 1, MAXZ)
    cell = 12.0 * jnp.eye(3, dtype=jnp.float32)
    pbc = np.array([False, False, False])

    # bidirectional all-pairs neighbor list (all within the 50 A cutoff)
    ii, jj = np.meshgrid(np.arange(n_atoms), np.arange(n_atoms), indexing="ij")
    mask = ii != jj
    edge_index = np.stack([ii[mask], jj[mask]]).astype(np.int32)   # (2, 552)
    unit_shifts = np.zeros((edge_index.shape[1], 3), np.float32)

    input_data = {"positions": pos, "Z": Z, "cell": cell, "pbc": pbc,
                  "edge_index": edge_index, "unit_shifts": unit_shifts}

    # edge_block=128 -> 5 edge blocks x 3 phases = 15 grid steps, exercising
    # block accumulation and the phase machinery on this small system.
    out = dftd3_pallas(input_data["positions"], input_data["Z"], input_data["cell"],
                       input_data["pbc"], input_data["edge_index"],
                       input_data["unit_shifts"], tables, edge_block=128)
    jax.block_until_ready(out["energy"])
    jax.block_until_ready(out["forces"])
    jax.block_until_ready(out["stress"])
    print("KERNEL_OK")
</pallas_src>

<mosaic_0001>
module attributes {stable_mosaic.version = 11 : i64} {
  func.func @_d3_kernel(%arg0: i32, %arg1: i32, %arg2: memref<8x128xf32, #tpu.memory_space<vmem>>, %arg3: memref<25x128xf32, #tpu.memory_space<vmem>>, %arg4: memref<25x128xf32, #tpu.memory_space<vmem>>, %arg5: memref<25x128xf32, #tpu.memory_space<vmem>>, %arg6: memref<2x128xi32, #tpu.memory_space<vmem>>, %arg7: memref<1x128xf32, #tpu.memory_space<vmem>>, %arg8: memref<1x128xf32, #tpu.memory_space<vmem>>, %arg9: memref<3x128xf32, #tpu.memory_space<vmem>>, %arg10: memref<1x128xf32, #tpu.memory_space<vmem>>) attributes {dimension_semantics = [#tpu.dimension_semantics<arbitrary>, #tpu.dimension_semantics<arbitrary>], iteration_bounds = array<i64: 3, 5>, scalar_prefetch = 0 : i64, scratch_operands = 0 : i64, tpu.core_type = #tpu.core_type<tc>, window_params = [{transform_indices = @transform_0, window_bounds = array<i64: 8, 128>}, {transform_indices = @transform_1, window_bounds = array<i64: 25, 128>}, {transform_indices = @transform_2, window_bounds = array<i64: 25, 128>}, {transform_indices = @transform_3, window_bounds = array<i64: 25, 128>}, {transform_indices = @transform_4, window_bounds = array<i64: 2, 128>}, {pipeline_mode = #tpu.pipeline_mode<synchronous>, transform_indices = @transform_5, window_bounds = array<i64: 1, 128>}, {pipeline_mode = #tpu.pipeline_mode<synchronous>, transform_indices = @transform_6, window_bounds = array<i64: 1, 128>}, {pipeline_mode = #tpu.pipeline_mode<synchronous>, transform_indices = @transform_7, window_bounds = array<i64: 3, 128>}, {pipeline_mode = #tpu.pipeline_mode<synchronous>, transform_indices = @transform_8, window_bounds = array<i64: 1, 128>}]} {
    %c0_i32 = arith.constant 0 : i32
    %0 = arith.cmpi eq, %arg0, %c0_i32 : i32
    %c0_i32_0 = arith.constant 0 : i32
    %1 = arith.cmpi eq, %arg1, %c0_i32_0 : i32
    %2 = arith.andi %0, %1 : i1
    %3 = arith.extui %2 : i1 to i32
    %c0_i32_1 = arith.constant 0 : i32
    %4 = arith.cmpi ne, %3, %c0_i32_1 : i32
    scf.if %4 {
      %cst_12 = arith.constant 0.000000e+00 : f32
      %36 = vector.broadcast %cst_12 : f32 to vector<1x128xf32>
      %c0_13 = arith.constant 0 : index
      %c0_14 = arith.constant 0 : index
      %37 = vector.load %arg7[%c0_13, %c0_14] : memref<1x128xf32, #tpu.memory_space<vmem>>, vector<1x128xf32>
      tpu.vector_store %arg7[%c0_13, %c0_14], %36 {strides = array<i32>} : memref<1x128xf32, #tpu.memory_space<vmem>>, vector<1x128xf32>,
      %cst_15 = arith.constant 0.000000e+00 : f32
      %38 = vector.broadcast %cst_15 : f32 to vector<1x128xf32>
      %c0_16 = arith.constant 0 : index
      %c0_17 = arith.constant 0 : index
      %39 = vector.load %arg8[%c0_16, %c0_17] : memref<1x128xf32, #tpu.memory_space<vmem>>, vector<1x128xf32>
      tpu.vector_store %arg8[%c0_16, %c0_17], %38 {strides = array<i32>} : memref<1x128xf32, #tpu.memory_space<vmem>>, vector<1x128xf32>,
      %cst_18 = arith.constant 0.000000e+00 : f32
      %40 = vector.broadcast %cst_18 : f32 to vector<3x128xf32>
      %c0_19 = arith.constant 0 : index
      %c0_20 = arith.constant 0 : index
      %41 = vector.load %arg9[%c0_19, %c0_20] : memref<3x128xf32, #tpu.memory_space<vmem>>, vector<3x128xf32>
      tpu.vector_store %arg9[%c0_19, %c0_20], %40 {strides = array<i32>} : memref<3x128xf32, #tpu.memory_space<vmem>>, vector<3x128xf32>,
      %cst_21 = arith.constant 0.000000e+00 : f32
      %42 = vector.broadcast %cst_21 : f32 to vector<1x128xf32>
      %c0_22 = arith.constant 0 : index
      %c0_23 = arith.constant 0 : index
      %43 = vector.load %arg10[%c0_22, %c0_23] : memref<1x128xf32, #tpu.memory_space<vmem>>, vector<1x128xf32>
      tpu.vector_store %arg10[%c0_22, %c0_23], %42 {strides = array<i32>} : memref<1x128xf32, #tpu.memory_space<vmem>>, vector<1x128xf32>,
    } else {
    }
    %c0 = arith.constant 0 : index
    %c0_2 = arith.constant 0 : index
    %5 = vector.load %arg2[%c0, %c0_2] : memref<8x128xf32, #tpu.memory_space<vmem>>, vector<8x128xf32>
    %6 = vector.extract_strided_slice %5 {offsets = [0, 0], sizes = [3, 128], strides = [1, 1]} : vector<8x128xf32> to vector<3x128xf32>
    %7 = vector.extract_strided_slice %5 {offsets = [3, 0], sizes = [1, 128], strides = [1, 1]} : vector<8x128xf32> to vector<1x128xf32>
    %8 = vector.extract_strided_slice %5 {offsets = [4, 0], sizes = [1, 128], strides = [1, 1]} : vector<8x128xf32> to vector<1x128xf32>
    %9 = vector.extract_strided_slice %5 {offsets = [5, 0], sizes = [1, 128], strides = [1, 1]} : vector<8x128xf32> to vector<1x128xf32>
    %10 = vector.extract_strided_slice %5 {offsets = [6, 0], sizes = [1, 128], strides = [1, 1]} : vector<8x128xf32> to vector<1x128xf32>
    %11 = arith.mulf %6, %6 : vector<3x128xf32>
    %cst = arith.constant dense<0.000000e+00> : vector<128xf32>
    %12 = vector.multi_reduction <add>, %11, %cst [0] : vector<3x128xf32> to vector<128xf32>
    %13 = vector.shape_cast %12 : vector<128xf32> to vector<1x128xf32>
    %cst_3 = arith.constant 0.000000e+00 : f32
    %14 = vector.broadcast %cst_3 : f32 to vector<1x128xf32>
    %15 = arith.cmpf ogt, %10, %14 : vector<1x128xf32>
    %cst_4 = arith.constant 1.000000e+00 : f32
    %16 = vector.broadcast %cst_4 : f32 to vector<1x128xf32>
    %17 = arith.select %15, %13, %16 : vector<1x128xi1>, vector<1x128xf32>
    %18 = math.sqrt %17 : vector<1x128xf32>
    %cst_5 = arith.constant 1.000000e+00 : f32
    %19 = vector.broadcast %cst_5 : f32 to vector<1x128xf32>
    %20 = arith.divf %19, %18 : vector<1x128xf32>
    %c0_6 = arith.constant 0 : index
    %c0_7 = arith.constant 0 : index
    %21 = vector.load %arg6[%c0_6, %c0_7] : memref<2x128xi32, #tpu.memory_space<vmem>>, vector<1x128xi32>
    %22 = tpu.iota {dimensions = array<i32: 0>} : vector<128x128xi32>
    %23 = vector.broadcast %21 : vector<1x128xi32> to vector<128x128xi32>
    %24 = arith.cmpi eq, %22, %23 : vector<128x128xi32>
    %25 = arith.extui %24 : vector<128x128xi1> to vector<128x128xi32>
    %26 = arith.sitofp %25 : vector<128x128xi32> to vector<128x128xf32>
    %c0_i32_8 = arith.constant 0 : i32
    %27 = arith.cmpi eq, %arg0, %c0_i32_8 : i32
    %28 = arith.extui %27 : i1 to i32
    %c0_i32_9 = arith.constant 0 : i32
    %29 = arith.cmpi ne, %28, %c0_i32_9 : i32
    scf.if %29 {
      %cst_12 = arith.constant 21.1670876 : f32
      %36 = vector.broadcast %cst_12 : f32 to vector<1x128xf32>
      %37 = arith.cmpf ole, %18, %36 : vector<1x128xf32>
      %cst_13 = arith.constant 0.000000e+00 : f32
      %38 = vector.broadcast %cst_13 : f32 to vector<1x128xf32>
      %39 = arith.cmpf ogt, %10, %38 : vector<1x128xf32>
      %40 = arith.andi %37, %39 : vector<1x128xi1>
      %cst_14 = arith.constant 1.000000e+00 : f32
      %cst_15 = arith.constant 0.000000e+00 : f32
      %41 = vector.broadcast %cst_14 : f32 to vector<1x128xf32>
      %42 = vector.broadcast %cst_15 : f32 to vector<1x128xf32>
      %43 = arith.select %40, %41, %42 : vector<1x128xi1>, vector<1x128xf32>
      %44 = arith.mulf %7, %20 : vector<1x128xf32>
      %cst_16 = arith.constant 1.000000e+00 : f32
      %45 = vector.broadcast %cst_16 : f32 to vector<1x128xf32>
      %46 = arith.subf %44, %45 : vector<1x128xf32>
      %cst_17 = arith.constant -1.600000e+01 : f32
      %47 = vector.broadcast %cst_17 : f32 to vector<1x128xf32>
      %48 = arith.mulf %47, %46 : vector<1x128xf32>
      %49 = math.exp %48 : vector<1x128xf32>
      %cst_18 = arith.constant 1.000000e+00 : f32
      %50 = vector.broadcast %cst_18 : f32 to vector<1x128xf32>
      %51 = arith.addf %50, %49 : vector<1x128xf32>
      %52 = arith.divf %43, %51 : vector<1x128xf32>
      %c0_19 = arith.constant 0 : index
      %c0_20 = arith.constant 0 : index
      %53 = vector.load %arg7[%c0_19, %c0_20] : memref<1x128xf32, #tpu.memory_space<vmem>>, vector<1x128xf32>
      %cst_21 = arith.constant dense<0.000000e+00> : vector<1x128xf32>
      %54 = tpu.matmul %52, %26, %cst_21 {dimension_numbers = #tpu.dot_dimension_numbers<[1], [1], [0], [0], [0, 0, 1, 0], [], []>} : vector<1x128xf32>, vector<128x128xf32>, vector<1x128xf32> -> vector<1x128xf32>
      %55 = arith.addf %53, %54 : vector<1x128xf32>
      %c0_22 = arith.constant 0 : index
      %c0_23 = arith.constant 0 : index
      %56 = vector.load %arg7[%c0_22, %c0_23] : memref<1x128xf32, #tpu.memory_space<vmem>>, vector<1x128xf32>
      tpu.vector_store %arg7[%c0_22, %c0_23], %55 {strides = array<i32>} : memref<1x128xf32, #tpu.memory_space<vmem>>, vector<1x128xf32>,
    } else {
    }
    %c1_i32 = arith.constant 1 : i32
    %30 = arith.cmpi eq, %arg0, %c1_i32 : i32
    %31 = arith.extui %30 : i1 to i32
    %c0_i32_10 = arith.constant 0 : i32
    %32 = arith.cmpi ne, %31, %c0_i32_10 : i32
    scf.if %32 {
      %c1 = arith.constant 1 : index
      %c0_12 = arith.constant 0 : index
      %36 = vector.load %arg6[%c1, %c0_12] : memref<2x128xi32, #tpu.memory_space<vmem>>, vector<1x128xi32>
      %37 = tpu.iota {dimensions = array<i32: 0>} : vector<128x128xi32>
      %38 = vector.broadcast %36 : vector<1x128xi32> to vector<128x128xi32>
      %39 = arith.cmpi eq, %37, %38 : vector<128x128xi32>
      %40 = arith.extui %39 : vector<128x128xi1> to vector<128x128xi32>
      %41 = arith.sitofp %40 : vector<128x128xi32> to vector<128x128xf32>
      %c0_13 = arith.constant 0 : index
      %c0_14 = arith.constant 0 : index
      %42 = vector.load %arg7[%c0_13, %c0_14] : memref<1x128xf32, #tpu.memory_space<vmem>>, vector<1x128xf32>
      %cst_15 = arith.constant dense<0.000000e+00> : vector<1x128xf32>
      %43 = tpu.matmul %42, %26, %cst_15 {dimension_numbers = #tpu.dot_dimension_numbers<[1], [0], [0], [1], [0, 0, 1, 1], [], []>} : vector<1x128xf32>, vector<128x128xf32>, vector<1x128xf32> -> vector<1x128xf32>
      %cst_16 = arith.constant dense<0.000000e+00> : vector<1x128xf32>
      %44 = tpu.matmul %42, %41, %cst_16 {dimension_numbers = #tpu.dot_dimension_numbers<[1], [0], [0], [1], [0, 0, 1, 1], [], []>} : vector<1x128xf32>, vector<128x128xf32>, vector<1x128xf32> -> vector<1x128xf32>
      %c0_17 = arith.constant 0 : index
      %c0_18 = arith.constant 0 : index
      %45 = vector.load %arg3[%c0_17, %c0_18] : memref<25x128xf32, #tpu.memory_space<vmem>>, vector<25x128xf32>
      %c0_19 = arith.constant 0 : index
      %c0_20 = arith.constant 0 : index
      %46 = vector.load %arg4[%c0_19, %c0_20] : memref<25x128xf32, #tpu.memory_space<vmem>>, vector<25x128xf32>
      %c0_21 = arith.constant 0 : index
      %c0_22 = arith.constant 0 : index
      %47 = vector.load %arg5[%c0_21, %c0_22] : memref<25x128xf32, #tpu.memory_space<vmem>>, vector<25x128xf32>
      %48 = vector.broadcast %43 : vector<1x128xf32> to vector<25x128xf32>
      %49 = arith.subf %46, %48 : vector<25x128xf32>
      %50 = arith.mulf %49, %49 : vector<25x128xf32>
      %51 = vector.broadcast %44 : vector<1x128xf32> to vector<25x128xf32>
      %52 = arith.subf %47, %51 : vector<25x128xf32>
      %53 = arith.mulf %52, %52 : vector<25x128xf32>
      %54 = arith.addf %50, %53 : vector<25x128xf32>
      %cst_23 = arith.constant 0.000000e+00 : f32
      %55 = vector.broadcast %cst_23 : f32 to vector<25x128xf32>
      %56 = arith.cmpf ogt, %45, %55 : vector<25x128xf32>
      %cst_24 = arith.constant -4.000000e+00 : f32
      %57 = vector.broadcast %cst_24 : f32 to vector<25x128xf32>
      %58 = arith.mulf %57, %54 : vector<25x128xf32>
      %59 = math.exp %58 : vector<25x128xf32>
      %cst_25 = arith.constant 0.000000e+00 : f32
      %60 = vector.broadcast %cst_25 : f32 to vector<25x128xf32>
      %61 = arith.select %56, %59, %60 : vector<25x128xi1>, vector<25x128xf32>
      %cst_26 = arith.constant dense<0.000000e+00> : vector<128xf32>
      %62 = vector.multi_reduction <add>, %61, %cst_26 [0] : vector<25x128xf32> to vector<128xf32>
      %63 = vector.shape_cast %62 : vector<128xf32> to vector<1x128xf32>
      %cst_27 = arith.constant 0.000000e+00 : f32
      %64 = vector.broadcast %cst_27 : f32 to vector<1x128xf32>
      %65 = arith.cmpf ogt, %63, %64 : vector<1x128xf32>
      %cst_28 = arith.constant 1.000000e+00 : f32
      %66 = vector.broadcast %cst_28 : f32 to vector<1x128xf32>
      %67 = arith.select %65, %63, %66 : vector<1x128xi1>, vector<1x128xf32>
      %cst_29 = arith.constant 1.000000e+00 : f32
      %68 = vector.broadcast %cst_29 : f32 to vector<1x128xf32>
      %69 = arith.divf %68, %67 : vector<1x128xf32>
      %70 = vector.broadcast %69 : vector<1x128xf32> to vector<25x128xf32>
      %71 = arith.mulf %61, %70 : vector<25x128xf32>
      %72 = arith.mulf %71, %45 : vector<25x128xf32>
      %cst_30 = arith.constant dense<0.000000e+00> : vector<128xf32>
      %73 = vector.multi_reduction <add>, %72, %cst_30 [0] : vector<25x128xf32> to vector<128xf32>
      %74 = vector.shape_cast %73 : vector<128xf32> to vector<1x128xf32>
      %cst_31 = arith.constant 3.000000e+00 : f32
      %75 = vector.broadcast %cst_31 : f32 to vector<1x128xf32>
      %76 = arith.mulf %75, %74 : vector<1x128xf32>
      %77 = arith.mulf %76, %9 : vector<1x128xf32>
      %78 = arith.mulf %20, %20 : vector<1x128xf32>
      %79 = arith.mulf %78, %78 : vector<1x128xf32>
      %80 = arith.mulf %79, %78 : vector<1x128xf32>
      %81 = arith.mulf %80, %78 : vector<1x128xf32>
      %82 = arith.mulf %8, %20 : vector<1x128xf32>
      %83 = arith.mulf %82, %82 : vector<1x128xf32>
      %84 = arith.mulf %83, %83 : vector<1x128xf32>
      %85 = arith.mulf %84, %84 : vector<1x128xf32>
      %86 = arith.mulf %85, %84 : vector<1x128xf32>
      %87 = arith.mulf %86, %83 : vector<1x128xf32>
      %cst_32 = arith.constant 15.6339273 : f32
      %88 = vector.broadcast %cst_32 : f32 to vector<1x128xf32>
      %89 = arith.mulf %88, %87 : vector<1x128xf32>
      %90 = arith.mulf %85, %85 : vector<1x128xf32>
      %cst_33 = arith.constant 1.000000e+00 : f32
      %91 = vector.broadcast %cst_33 : f32 to vector<1x128xf32>
      %92 = arith.mulf %91, %90 : vector<1x128xf32>
      %cst_34 = arith.constant 6.000000e+00 : f32
      %93 = vector.broadcast %cst_34 : f32 to vector<1x128xf32>
      %94 = arith.mulf %93, %89 : vector<1x128xf32>
      %cst_35 = arith.constant 1.000000e+00 : f32
      %95 = vector.broadcast %cst_35 : f32 to vector<1x128xf32>
      %96 = arith.addf %95, %94 : vector<1x128xf32>
      %cst_36 = arith.constant 1.000000e+00 : f32
      %97 = vector.broadcast %cst_36 : f32 to vector<1x128xf32>
      %98 = arith.divf %97, %96 : vector<1x128xf32>
      %cst_37 = arith.constant 6.000000e+00 : f32
      %99 = vector.broadcast %cst_37 : f32 to vector<1x128xf32>
      %100 = arith.mulf %99, %92 : vector<1x128xf32>
      %cst_38 = arith.constant 1.000000e+00 : f32
      %101 = vector.broadcast %cst_38 : f32 to vector<1x128xf32>
      %102 = arith.addf %101, %100 : vector<1x128xf32>
      %cst_39 = arith.constant 1.000000e+00 : f32
      %103 = vector.broadcast %cst_39 : f32 to vector<1x128xf32>
      %104 = arith.divf %103, %102 : vector<1x128xf32>
      %cst_40 = arith.constant 50.2718353 : f32
      %105 = vector.broadcast %cst_40 : f32 to vector<1x128xf32>
      %106 = arith.cmpf ole, %18, %105 : vector<1x128xf32>
      %cst_41 = arith.constant 0.000000e+00 : f32
      %107 = vector.broadcast %cst_41 : f32 to vector<1x128xf32>
      %108 = arith.cmpf ogt, %10, %107 : vector<1x128xf32>
      %109 = arith.andi %106, %108 : vector<1x128xi1>
      %cst_42 = arith.constant 1.000000e+00 : f32
      %cst_43 = arith.constant 0.000000e+00 : f32
      %110 = vector.broadcast %cst_42 : f32 to vector<1x128xf32>
      %111 = vector.broadcast %cst_43 : f32 to vector<1x128xf32>
      %112 = arith.select %109, %110, %111 : vector<1x128xi1>, vector<1x128xf32>
      %cst_44 = arith.constant -5.000000e-01 : f32
      %113 = vector.broadcast %cst_44 : f32 to vector<1x128xf32>
      %114 = arith.mulf %113, %74 : vector<1x128xf32>
      %115 = arith.mulf %114, %98 : vector<1x128xf32>
      %116 = arith.mulf %115, %80 : vector<1x128xf32>
      %cst_45 = arith.constant -3.610000e-01 : f32
      %117 = vector.broadcast %cst_45 : f32 to vector<1x128xf32>
      %118 = arith.mulf %117, %77 : vector<1x128xf32>
      %119 = arith.mulf %118, %104 : vector<1x128xf32>
      %120 = arith.mulf %119, %81 : vector<1x128xf32>
      %c0_46 = arith.constant 0 : index
      %c0_47 = arith.constant 0 : index
      %121 = vector.load %arg8[%c0_46, %c0_47] : memref<1x128xf32, #tpu.memory_space<vmem>>, vector<1x128xf32>
      %122 = arith.addf %116, %120 : vector<1x128xf32>
      %123 = arith.mulf %122, %112 : vector<1x128xf32>
      %124 = vector.shape_cast %123 : vector<1x128xf32> to vector<1x1x128xf32>
      %cst_48 = arith.constant dense<0.000000e+00> : vector<1xf32>
      %125 = vector.multi_reduction <add>, %124, %cst_48 [1, 2] : vector<1x1x128xf32> to vector<1xf32>
      %126 = vector.shape_cast %125 : vector<1xf32> to vector<1x1x1xf32>
      %127 = vector.extract %126[0, 0, 0] : f32 from vector<1x1x1xf32>
      %128 = vector.broadcast %127 : f32 to vector<1x128xf32>
      %129 = arith.addf %121, %128 : vector<1x128xf32>
      %c0_49 = arith.constant 0 : index
      %c0_50 = arith.constant 0 : index
      %130 = vector.load %arg8[%c0_49, %c0_50] : memref<1x128xf32, #tpu.memory_space<vmem>>, vector<1x128xf32>
      tpu.vector_store %arg8[%c0_49, %c0_50], %129 {strides = array<i32>} : memref<1x128xf32, #tpu.memory_space<vmem>>, vector<1x128xf32>,
      %cst_51 = arith.constant -5.000000e-01 : f32
      %131 = vector.broadcast %cst_51 : f32 to vector<1x128xf32>
      %132 = arith.mulf %131, %74 : vector<1x128xf32>
      %133 = arith.mulf %132, %98 : vector<1x128xf32>
      %cst_52 = arith.constant 8.400000e+01 : f32
      %134 = vector.broadcast %cst_52 : f32 to vector<1x128xf32>
      %135 = arith.mulf %134, %89 : vector<1x128xf32>
      %136 = arith.mulf %135, %98 : vector<1x128xf32>
      %cst_53 = arith.constant 6.000000e+00 : f32
      %137 = vector.broadcast %cst_53 : f32 to vector<1x128xf32>
      %138 = arith.subf %136, %137 : vector<1x128xf32>
      %139 = arith.mulf %133, %138 : vector<1x128xf32>
      %140 = arith.mulf %139, %80 : vector<1x128xf32>
      %141 = arith.mulf %140, %20 : vector<1x128xf32>
      %cst_54 = arith.constant -3.610000e-01 : f32
      %142 = vector.broadcast %cst_54 : f32 to vector<1x128xf32>
      %143 = arith.mulf %142, %77 : vector<1x128xf32>
      %144 = arith.mulf %143, %104 : vector<1x128xf32>
      %cst_55 = arith.constant 9.600000e+01 : f32
      %145 = vector.broadcast %cst_55 : f32 to vector<1x128xf32>
      %146 = arith.mulf %145, %92 : vector<1x128xf32>
      %147 = arith.mulf %146, %104 : vector<1x128xf32>
      %cst_56 = arith.constant 8.000000e+00 : f32
      %148 = vector.broadcast %cst_56 : f32 to vector<1x128xf32>
      %149 = arith.subf %147, %148 : vector<1x128xf32>
      %150 = arith.mulf %144, %149 : vector<1x128xf32>
      %151 = arith.mulf %150, %81 : vector<1x128xf32>
      %152 = arith.mulf %151, %20 : vector<1x128xf32>
      %153 = arith.addf %141, %152 : vector<1x128xf32>
      %154 = arith.mulf %153, %112 : vector<1x128xf32>
      %cst_57 = arith.constant -5.000000e-01 : f32
      %155 = vector.broadcast %cst_57 : f32 to vector<1x128xf32>
      %156 = arith.mulf %155, %98 : vector<1x128xf32>
      %157 = arith.mulf %156, %80 : vector<1x128xf32>
      %cst_58 = arith.constant 1.083000e+00 : f32
      %158 = vector.broadcast %cst_58 : f32 to vector<1x128xf32>
      %159 = arith.mulf %158, %9 : vector<1x128xf32>
      %160 = arith.mulf %159, %104 : vector<1x128xf32>
      %161 = arith.mulf %160, %81 : vector<1x128xf32>
      %162 = arith.subf %157, %161 : vector<1x128xf32>
      %163 = arith.mulf %162, %112 : vector<1x128xf32>
      %164 = vector.broadcast %74 : vector<1x128xf32> to vector<25x128xf32>
      %165 = arith.subf %45, %164 : vector<25x128xf32>
      %166 = arith.mulf %71, %165 : vector<25x128xf32>
      %cst_59 = arith.constant -8.000000e+00 : f32
      %167 = vector.broadcast %cst_59 : f32 to vector<25x128xf32>
      %168 = arith.mulf %166, %167 : vector<25x128xf32>
      %169 = vector.broadcast %43 : vector<1x128xf32> to vector<25x128xf32>
      %170 = arith.subf %169, %46 : vector<25x128xf32>
      %171 = arith.mulf %168, %170 : vector<25x128xf32>
      %cst_60 = arith.constant dense<0.000000e+00> : vector<128xf32>
      %172 = vector.multi_reduction <add>, %171, %cst_60 [0] : vector<25x128xf32> to vector<128xf32>
      %173 = vector.shape_cast %172 : vector<128xf32> to vector<1x128xf32>
      %174 = arith.mulf %163, %173 : vector<1x128xf32>
      %cst_61 = arith.constant -8.000000e+00 : f32
      %175 = vector.broadcast %cst_61 : f32 to vector<25x128xf32>
      %176 = arith.mulf %166, %175 : vector<25x128xf32>
      %177 = vector.broadcast %44 : vector<1x128xf32> to vector<25x128xf32>
      %178 = arith.subf %177, %47 : vector<25x128xf32>
      %179 = arith.mulf %176, %178 : vector<25x128xf32>
      %cst_62 = arith.constant dense<0.000000e+00> : vector<128xf32>
      %180 = vector.multi_reduction <add>, %179, %cst_62 [0] : vector<25x128xf32> to vector<128xf32>
      %181 = vector.shape_cast %180 : vector<128xf32> to vector<1x128xf32>
      %182 = arith.mulf %163, %181 : vector<1x128xf32>
      %183 = arith.mulf %20, %154 : vector<1x128xf32>
      %184 = vector.broadcast %183 : vector<1x128xf32> to vector<3x128xf32>
      %185 = arith.mulf %6, %184 : vector<3x128xf32>
      %186 = tpu.concatenate %185, %174 in 0 : vector<3x128xf32>, vector<1x128xf32> -> vector<4x128xf32>
      %187 = tpu.concatenate %185, %182 in 0 : vector<3x128xf32>, vector<1x128xf32> -> vector<4x128xf32>
      %cst_63 = arith.constant dense<0.000000e+00> : vector<4x128xf32>
      %188 = tpu.matmul %186, %26, %cst_63 {dimension_numbers = #tpu.dot_dimension_numbers<[1], [1], [0], [0], [0, 0, 1, 0], [], []>} : vector<4x128xf32>, vector<128x128xf32>, vector<4x128xf32> -> vector<4x128xf32>
      %cst_64 = arith.constant dense<0.000000e+00> : vector<4x128xf32>
      %189 = tpu.matmul %187, %41, %cst_64 {dimension_numbers = #tpu.dot_dimension_numbers<[1], [1], [0], [0], [0, 0, 1, 0], [], []>} : vector<4x128xf32>, vector<128x128xf32>, vector<4x128xf32> -> vector<4x128xf32>
      %c0_65 = arith.constant 0 : index
      %c0_66 = arith.constant 0 : index
      %190 = vector.load %arg9[%c0_65, %c0_66] : memref<3x128xf32, #tpu.memory_space<vmem>>, vector<3x128xf32>
      %191 = vector.extract_strided_slice %188 {offsets = [0, 0], sizes = [3, 128], strides = [1, 1]} : vector<4x128xf32> to vector<3x128xf32>
      %192 = vector.extract_strided_slice %189 {offsets = [0, 0], sizes = [3, 128], strides = [1, 1]} : vector<4x128xf32> to vector<3x128xf32>
      %193 = arith.subf %191, %192 : vector<3x128xf32>
      %194 = arith.addf %190, %193 : vector<3x128xf32>
      %c0_67 = arith.constant 0 : index
      %c0_68 = arith.constant 0 : index
      %195 = vector.load %arg9[%c0_67, %c0_68] : memref<3x128xf32, #tpu.memory_space<vmem>>, vector<3x128xf32>
      tpu.vector_store %arg9[%c0_67, %c0_68], %194 {strides = array<i32>} : memref<3x128xf32, #tpu.memory_space<vmem>>, vector<3x128xf32>,
      %c0_69 = arith.constant 0 : index
      %c0_70 = arith.constant 0 : index
      %196 = vector.load %arg10[%c0_69, %c0_70] : memref<1x128xf32, #tpu.memory_space<vmem>>, vector<1x128xf32>
      %197 = vector.extract_strided_slice %188 {offsets = [3, 0], sizes = [1, 128], strides = [1, 1]} : vector<4x128xf32> to vector<1x128xf32>
      %198 = vector.extract_strided_slice %189 {offsets = [3, 0], sizes = [1, 128], strides = [1, 1]} : vector<4x128xf32> to vector<1x128xf32>
      %199 = arith.addf %197, %198 : vector<1x128xf32>
      %200 = arith.addf %196, %199 : vector<1x128xf32>
      %c0_71 = arith.constant 0 : index
      %c0_72 = arith.constant 0 : index
      %201 = vector.load %arg10[%c0_71, %c0_72] : memref<1x128xf32, #tpu.memory_space<vmem>>, vector<1x128xf32>
      tpu.vector_store %arg10[%c0_71, %c0_72], %200 {strides = array<i32>} : memref<1x128xf32, #tpu.memory_space<vmem>>, vector<1x128xf32>,
    } else {
    }
    %c2_i32 = arith.constant 2 : i32
    %33 = arith.cmpi eq, %arg0, %c2_i32 : i32
    %34 = arith.extui %33 : i1 to i32
    %c0_i32_11 = arith.constant 0 : i32
    %35 = arith.cmpi ne, %34, %c0_i32_11 : i32
    scf.if %35 {
      %c1 = arith.constant 1 : index
      %c0_12 = arith.constant 0 : index
      %36 = vector.load %arg6[%c1, %c0_12] : memref<2x128xi32, #tpu.memory_space<vmem>>, vector<1x128xi32>
      %37 = tpu.iota {dimensions = array<i32: 0>} : vector<128x128xi32>
      %38 = vector.broadcast %36 : vector<1x128xi32> to vector<128x128xi32>
      %39 = arith.cmpi eq, %37, %38 : vector<128x128xi32>
      %40 = arith.extui %39 : vector<128x128xi1> to vector<128x128xi32>
      %41 = arith.sitofp %40 : vector<128x128xi32> to vector<128x128xf32>
      %cst_13 = arith.constant 21.1670876 : f32
      %42 = vector.broadcast %cst_13 : f32 to vector<1x128xf32>
      %43 = arith.cmpf ole, %18, %42 : vector<1x128xf32>
      %cst_14 = arith.constant 0.000000e+00 : f32
      %44 = vector.broadcast %cst_14 : f32 to vector<1x128xf32>
      %45 = arith.cmpf ogt, %10, %44 : vector<1x128xf32>
      %46 = arith.andi %43, %45 : vector<1x128xi1>
      %cst_15 = arith.constant 1.000000e+00 : f32
      %cst_16 = arith.constant 0.000000e+00 : f32
      %47 = vector.broadcast %cst_15 : f32 to vector<1x128xf32>
      %48 = vector.broadcast %cst_16 : f32 to vector<1x128xf32>
      %49 = arith.select %46, %47, %48 : vector<1x128xi1>, vector<1x128xf32>
      %50 = arith.mulf %7, %20 : vector<1x128xf32>
      %cst_17 = arith.constant 1.000000e+00 : f32
      %51 = vector.broadcast %cst_17 : f32 to vector<1x128xf32>
      %52 = arith.subf %50, %51 : vector<1x128xf32>
      %cst_18 = arith.constant -1.600000e+01 : f32
      %53 = vector.broadcast %cst_18 : f32 to vector<1x128xf32>
      %54 = arith.mulf %53, %52 : vector<1x128xf32>
      %55 = math.exp %54 : vector<1x128xf32>
      %cst_19 = arith.constant 1.000000e+00 : f32
      %56 = vector.broadcast %cst_19 : f32 to vector<1x128xf32>
      %57 = arith.addf %56, %55 : vector<1x128xf32>
      %58 = arith.divf %49, %57 : vector<1x128xf32>
      %cst_20 = arith.constant 1.000000e+00 : f32
      %59 = vector.broadcast %cst_20 : f32 to vector<1x128xf32>
      %60 = arith.subf %59, %58 : vector<1x128xf32>
      %61 = arith.mulf %58, %60 : vector<1x128xf32>
      %cst_21 = arith.constant 1.600000e+01 : f32
      %62 = vector.broadcast %cst_21 : f32 to vector<1x128xf32>
      %63 = arith.mulf %61, %62 : vector<1x128xf32>
      %cst_22 = arith.constant 0.000000e+00 : f32
      %64 = vector.broadcast %cst_22 : f32 to vector<1x128xf32>
      %65 = arith.subf %64, %7 : vector<1x128xf32>
      %66 = arith.mulf %65, %20 : vector<1x128xf32>
      %67 = arith.mulf %66, %20 : vector<1x128xf32>
      %68 = arith.mulf %63, %67 : vector<1x128xf32>
      %c0_23 = arith.constant 0 : index
      %c0_24 = arith.constant 0 : index
      %69 = vector.load %arg10[%c0_23, %c0_24] : memref<1x128xf32, #tpu.memory_space<vmem>>, vector<1x128xf32>
      %cst_25 = arith.constant dense<0.000000e+00> : vector<1x128xf32>
      %70 = tpu.matmul %69, %26, %cst_25 {dimension_numbers = #tpu.dot_dimension_numbers<[1], [0], [0], [1], [0, 0, 1, 1], [], []>} : vector<1x128xf32>, vector<128x128xf32>, vector<1x128xf32> -> vector<1x128xf32>
      %71 = arith.mulf %70, %68 : vector<1x128xf32>
      %72 = arith.mulf %20, %71 : vector<1x128xf32>
      %73 = vector.broadcast %72 : vector<1x128xf32> to vector<3x128xf32>
      %74 = arith.mulf %6, %73 : vector<3x128xf32>
      %cst_26 = arith.constant dense<0.000000e+00> : vector<3x128xf32>
      %75 = tpu.matmul %74, %26, %cst_26 {dimension_numbers = #tpu.dot_dimension_numbers<[1], [1], [0], [0], [0, 0, 1, 0], [], []>} : vector<3x128xf32>, vector<128x128xf32>, vector<3x128xf32> -> vector<3x128xf32>
      %cst_27 = arith.constant dense<0.000000e+00> : vector<3x128xf32>
      %76 = tpu.matmul %74, %41, %cst_27 {dimension_numbers = #tpu.dot_dimension_numbers<[1], [1], [0], [0], [0, 0, 1, 0], [], []>} : vector<3x128xf32>, vector<128x128xf32>, vector<3x128xf32> -> vector<3x128xf32>
      %c0_28 = arith.constant 0 : index
      %c0_29 = arith.constant 0 : index
      %77 = vector.load %arg9[%c0_28, %c0_29] : memref<3x128xf32, #tpu.memory_space<vmem>>, vector<3x128xf32>
      %78 = arith.subf %75, %76 : vector<3x128xf32>
      %79 = arith.addf %77, %78 : vector<3x128xf32>
      %c0_30 = arith.constant 0 : index
      %c0_31 = arith.constant 0 : index
      %80 = vector.load %arg9[%c0_30, %c0_31] : memref<3x128xf32, #tpu.memory_space<vmem>>, vector<3x128xf32>
      tpu.vector_store %arg9[%c0_30, %c0_31], %79 {strides = array<i32>} : memref<3x128xf32, #tpu.memory_space<vmem>>, vector<3x128xf32>,
    } else {
    }
    return
  }
  func.func @transform_0(%arg0: i32, %arg1: i32) -> (i32, i32) {
    %c0_i32 = arith.constant 0 : i32
    %c0_i32_0 = arith.constant 0 : i32
    return %c0_i32, %arg1 : i32, i32
  }
  func.func @transform_1(%arg0: i32, %arg1: i32) -> (i32, i32) {
    %c1_i32 = arith.constant 1 : i32
    %0 = arith.cmpi eq, %arg0, %c1_i32 : i32
    %c0_i32 = arith.constant 0 : i32
    %1 = arith.select %0, %arg1, %c0_i32 : i32
    %c0_i32_0 = arith.constant 0 : i32
    %c0_i32_1 = arith.constant 0 : i32
    return %c0_i32_0, %1 : i32, i32
  }
  func.func @transform_2(%arg0: i32, %arg1: i32) -> (i32, i32) {
    %c1_i32 = arith.constant 1 : i32
    %0 = arith.cmpi eq, %arg0, %c1_i32 : i32
    %c0_i32 = arith.constant 0 : i32
    %1 = arith.select %0, %arg1, %c0_i32 : i32
    %c0_i32_0 = arith.constant 0 : i32
    %c0_i32_1 = arith.constant 0 : i32
    return %c0_i32_0, %1 : i32, i32
  }
  func.func @transform_3(%arg0: i32, %arg1: i32) -> (i32, i32) {
    %c1_i32 = arith.constant 1 : i32
    %0 = arith.cmpi eq, %arg0, %c1_i32 : i32
    %c0_i32 = arith.constant 0 : i32
    %1 = arith.select %0, %arg1, %c0_i32 : i32
    %c0_i32_0 = arith.constant 0 : i32
    %c0_i32_1 = arith.constant 0 : i32
    return %c0_i32_0, %1 : i32, i32
  }
  func.func @transform_4(%arg0: i32, %arg1: i32) -> (i32, i32) {
    %c0_i32 = arith.constant 0 : i32
    %c0_i32_0 = arith.constant 0 : i32
    return %c0_i32, %arg1 : i32, i32
  }
  func.func @transform_5(%arg0: i32, %arg1: i32) -> (i32, i32) {
    %c0_i32 = arith.constant 0 : i32
    %c0_i32_0 = arith.constant 0 : i32
    %c0_i32_1 = arith.constant 0 : i32
    return %c0_i32, %c0_i32_0 : i32, i32
  }
  func.func @transform_6(%arg0: i32, %arg1: i32) -> (i32, i32) {
    %c0_i32 = arith.constant 0 : i32
    %c0_i32_0 = arith.constant 0 : i32
    %c0_i32_1 = arith.constant 0 : i32
    return %c0_i32, %c0_i32_0 : i32, i32
  }
  func.func @transform_7(%arg0: i32, %arg1: i32) -> (i32, i32) {
    %c0_i32 = arith.constant 0 : i32
    %c0_i32_0 = arith.constant 0 : i32
    %c0_i32_1 = arith.constant 0 : i32
    return %c0_i32, %c0_i32_0 : i32, i32
  }
  func.func @transform_8(%arg0: i32, %arg1: i32) -> (i32, i32) {
    %c0_i32 = arith.constant 0 : i32
    %c0_i32_0 = arith.constant 0 : i32
    %c0_i32_1 = arith.constant 0 : i32
    return %c0_i32, %c0_i32_0 : i32, i32
  }
}

</mosaic_0001>

<bundles_post_ra>
// kernel: tpu_custom_call.1
= control target key start
LH: loop header
LB: loop body
LE: loop exit
PB: predicated region body
PF: predicated region fallthrough
CT: control target
= control target key end

     0   :  { %s3380_s0 = inlined_call_operand.hbm [shape: f32[8,640], index: 0, kind: input, shape index: {}]   ;;  %s3381_s1 = inlined_call_operand.hbm [shape: f32[25,640], index: 1, kind: input, shape index: {}]   ;;  %s3382_s2 = inlined_call_operand.hbm [shape: f32[25,640], index: 2, kind: input, shape index: {}]   ;;  %s3383_s3 = inlined_call_operand.hbm [shape: f32[25,640], index: 3, kind: input, shape index: {}]   ;;  %s3384_s4 = inlined_call_operand.hbm [shape: s32[2,640], index: 4, kind: input, shape index: {}]   ;;  %s3385_s5 = inlined_call_operand.hbm [shape: f32[1,128], index: 5, kind: output, shape index: {0}]   ;;  %s3386_s6 = inlined_call_operand.hbm [shape: f32[1,128], index: 6, kind: output, shape index: {1}]   ;;  %s3387_s7 = inlined_call_operand.hbm [shape: f32[3,128], index: 7, kind: output, shape index: {2}]   ;;  %s3388_s8 = inlined_call_operand.hbm [shape: f32[1,128], index: 8, kind: output, shape index: {3}]  }
   0x1   :  { %3459 = sst [smem:[#allocation49_spill]] %s3380_s0 }
   0x2   :  { %3460 = sst [smem:[#allocation50_spill]] %s3381_s1 }
   0x3   :  { %3461 = sst [smem:[#allocation51_spill]] %s3382_s2 }
   0x4   :  { %3462 = sst [smem:[#allocation52_spill]] %s3383_s3 }
   0x5   :  { %3463 = sst [smem:[#allocation53_spill]] %s3385_s5 }
   0x6   :  { %3464 = sst [smem:[#allocation54_spill]] %s3386_s6 }
   0x7   :  { %3465 = sst [smem:[#allocation55_spill]] %s3387_s7 }
   0x8   :  { %3466 = sst [smem:[#allocation56_spill]] %s3388_s8 }
   0x9   :  { %14 = vsyncpa [#allocation3], 0 }
   0xa   :  { %16 = vsyncpa [#allocation3 + $0x1], 0 }
   0xb   :  { %17 = vsyncpa [#allocation6], 0 }
   0xc   :  { %19 = vsyncpa [#allocation6 + $0x1], 0 }
   0xd   :  { %20 = vsyncpa [#allocation9], 0 }
   0xe   :  { %22 = vsyncpa [#allocation9 + $0x1], 0 }
   0xf   :  { %23 = vsyncpa [#allocation4], 0 }
  0x10   :  { %24 = vsyncpa [#allocation13], 0 }
  0x11   :  { %25 = vsyncpa [#allocation16], 0  ;;  %s2340_s27 = smov 0   ;;  %s2342_s28 = smov 0  }
  0x12   :  { %s2344_s29 = smov 0   ;;  %s2346_s30 = smov 0  }
  0x13   :  { %s2348_s9 = smov 0   ;;  %s2350_s10 = smov 0  }
  0x14   :  { %s2352_s11 = smov 0   ;;  %s2354_s12 = smov 0  }
  0x15   :  { %s2356_s13 = smov 0   ;;  %s2358_s14 = smov 0  }
  0x16   :  { %s2360_s15 = smov 0  }
  0x17 LB: > { %3467 = sst [smem:[#allocation24_spill]] %s2247_s29  ;;  %s40_s16 = sadd.s32 1, %s2271_s13  ;;  %s2279_s15 = sphi %s2360_s15, %s31_s15   ;;  %s2275_s14 = sphi %s2358_s14, %s3625_s14   ;;  %s2271_s13 = sphi %s2356_s13, %s3631_s13   ;;  %s2267_s12 = sphi %s2354_s12, %s3623_s12   ;;  %s2263_s11 = sphi %s2352_s11, %s3630_s11   ;;  %s2259_s10 = sphi %s2350_s10, %s3622_s10   ;;  %s2255_s9 = sphi %s2348_s9, %s3629_s9   ;;  %s2251_s30 = sphi %s2346_s30, %s3628_s30   ;;  %s2247_s29 = sphi %s2344_s29, %s3620_s29   ;;  %s2243_s28 = sphi %s2342_s28, %s3627_s28   ;;  %s2239_s27 = sphi %s2340_s27, %s3626_s27  }
  0x18   : > { %3468 = sst [smem:[#allocation25_spill]] %s2259_s10  ;;  %s43_s17 = sadd.s32 1, %s2275_s14 }
  0x19   : > { %3469 = sst [smem:[#allocation26_spill]] %s2263_s11  ;;  %p41_p0 = scmp.ge.s32.totalorder %s40_s16, 5 }
  0x1a   : > { %3470 = sst [smem:[#allocation27_spill]] %s2267_s12  ;;  %p58_p1 = scmp.eq.s32.totalorder %s2279_s15, 0 }
  0x1b   : > { %3471 = sst [smem:[#allocation28_spill]] %s2275_s14  ;;  %p73_p2 = scmp.eq.s32.totalorder %s2275_s14, 1 }
  0x1c   : > { %3472 = sst [smem:[#allocation29_spill]] %s2279_s15  ;;  %s80_s18 = sadd.s32 1, %s2247_s29 }
  0x1d   : > { %s3633_s16 = smov (%p41_p0, %s40_s16), 0  ;;  %s3635_s17 = smov (!%p41_p0, %s43_s17), %s2275_s14 }
  0x1e   : > { %3473 = sst [smem:[#allocation30_spill]] %s3633_s16  ;;  %p45_p3 = scmp.ge.s32.totalorder %s3635_s17, 3 }
  0x1f   : > { %s74_s19 = scalar_select %p73_p2, %s2271_s13, 0 }
  0x20   : > { %p87_p4 = scmp.ne.s32.totalorder %s2247_s29, %s2243_s28  ;;  %p1763_p5 = scmp.lt.s32.totalorder %s2279_s15, 15 }
  0x21   : > { %s3637_s17 = smov (%p45_p3, %s3635_s17), 0  ;;  %s308_s22 = sand.u32 1, %s2247_s29  }
  0x22   : > { %3474 = sst [smem:[#allocation31_spill]] %s3637_s17  ;;  %p2411_p6 = por %p87_p4, %p58_p1 }
  0x23   : > { %p75_p7 = scmp.eq.s32.totalorder %s3637_s17, 1  ;;  %s2418_s23 = sshll.u32 %s74_s19, 3 }
  0x24   : > { %s2421_s25 = sshll.u32 %s308_s22, 5  ;;  %s3476_s1 = sld [smem:[#allocation50_spill]] }
  0x25   : > { %s76_s24 = scalar_select %p75_p7, %s3633_s16, 0 }
  0x26   : > { %s310_s17 = scalar_lea.vmem [#allocation5], %s2421_s25  ;;  %p2435_p9 = pnand %p1763_p5, %p2411_p6 }
  0x27   : > { %s77_s7 = ssub.s32 %s74_s19, %s76_s24  ;;  %s319_s5 = sshll.u32 %s310_s17, 4  ;;  %s320_s5 = int_to_ptr.vmem [resolvable:$true] %s319_s5 }
  0x28   : > { %p78_p8 = scmp.eq.s32.totalorder %s77_s7, 0  ;;  %s3479_s22 = sand.u32 1, %s2279_s15  }
  0x29   : > { %s2441_s7 = scalar_lea.sflag [#allocation6], %s3479_s22  ;;  %s3393_s17 = smov 128  }
  0x2a   : > { %s316_s8 = scalar_lea.hbm %s3476_s1, %s2418_s23  ;;  %p1520_p10 = scmp.ge.s32.totalorder %s2279_s15, 1 }
  0x2b   : > { %s317_s21 = sshll.u32 %s316_s8, 4  ;;  %s3391_s8 = smov 640   ;;  %s318_s21 = int_to_ptr.hbm [resolvable:$true] %s317_s21 }
  0x2c   : > { %s2429_s6 = scalar_select %p78_p8, %s2247_s29, %s80_s18  }
  0x2d   : > { %s3395_s18 = smov 8   ;;  %p392_p11 = scmp.lt.s32.totalorder %s2279_s15, 16 }
  0x2e   : > { %3477 = sst [smem:[#allocation32_spill]] %s2429_s6  ;;  %s3483_s1 = smov 128  }
  0x2f   : > { %1753 = dma.hbm_to_vmem [thread:$0]  (!%p2435_p9), %s318_s21, 512, %s320_s5, %s2441_s7, %s3391_s8, %s3393_s17, %s3395_s18  }
  0x30   : > { %p2451_p12 = pnand %p1520_p10, %p392_p11  ;;  %s3481_s3 = sld [smem:[#allocation52_spill]] }
  0x31   : > { %s356_s5 = scalar_lea.vmem [#allocation8], %s2421_s25  ;;  %s3482_s8 = sand.u32 1, %s2279_s15  }
  0x32   : > { %s365_s21 = sshll.u32 %s356_s5, 4  ;;  %s2462_s17 = scalar_lea.sflag [#allocation9], %s3482_s8  ;;  %s366_s21 = int_to_ptr.vmem [resolvable:$true] %s365_s21 }
  0x33   : > { %s3484_s6 = smov 640   ;;  %s2471_s20 = sadd.s32 4294967295, %s2279_s15  }
  0x34   : > { %s47_s24 = ssub.s32 %s2271_s13, %s3633_s16  ;;  %p57_p0 = scmp.ne.s32.totalorder %s2259_s10, %s2255_s9 }
  0x35   : > { %p48_p13 = scmp.eq.s32.totalorder %s47_s24, 0  ;;  %p63_p2 = scmp.ne.s32.totalorder %s2255_s9, %s2251_s30 }
  0x36   : > { %s362_s26 = scalar_lea.hbm %s3481_s3, %s2418_s23  ;;  %p2485_p3 = por %p58_p1, %p57_p0 }
  0x37   : > { %s363_s22 = sshll.u32 %s362_s26, 4  ;;  %s50_s26 = sadd.s32 1, %s2259_s10  ;;  %s364_s22 = int_to_ptr.hbm [resolvable:$true] %s363_s22 }
  0x38   : > { %1759 = dma.hbm_to_vmem [thread:$0]  (!%p2435_p9), %s364_s22, 512, %s366_s21, %s2462_s17, %s3484_s6, %s3483_s1, %s3395_s18  }
  0x39   : > { %s2481_s5 = scalar_select %p48_p13, %s2259_s10, %s50_s26  }
  0x3a   : > { %p64_p4 = scmp.eq.s32.totalorder %s2471_s20, 0  ;;  %p93_p6 = scmp.ne.s32.totalorder %s2243_s28, %s2239_s27 }
  0x3b   : > { %3485 = sst [smem:[#allocation33_spill]] %s2481_s5  ;;  %s287_s22 = sand.u32 1, %s2259_s10  }
  0x3c   : > { %p2493_p7 = por %p64_p4, %p63_p2  ;;  %p2497_p8 = por %p93_p6, %p64_p4 }
  0x3d   : > { %s1510_s24 = sshll.u32 %s287_s22, 3  ;;  %s1511_s26 = sshll.u32 %s2271_s13, 3 }
  0x3e   : > { %s3489_s0 = sld [smem:[#allocation49_spill]]  ;;  %s291_s5 = scalar_lea.vmem [#allocation2], %s1510_s24 }
  0x3f   : > { %s299_s27 = sshll.u32 %s291_s5, 4  ;;  %p2509_p1 = pnand %p1763_p5, %p2485_p3  ;;  %s300_s27 = int_to_ptr.vmem [resolvable:$true] %s299_s27 }
  0x40   : > { %s3491_s2 = sld [smem:[#allocation51_spill]]  ;;  %s288_s24 = scalar_lea.sflag [#allocation3], %s287_s22 }
  0x41   : > { %s1518_s8 = sshll.u32 %s287_s22, 1 }
  0x44   : > { %s295_s16 = scalar_lea.hbm %s3489_s0, %s1511_s26  ;;  %s3492_s26 = smov 8  }
  0x45   : > { %s297_s10 = sshll.u32 %s295_s16, 4  ;;  %s333_s16 = scalar_lea.vmem [#allocation7], %s2421_s25  ;;  %s298_s10 = int_to_ptr.hbm [resolvable:$true] %s297_s10 }
  0x46   : > { %s339_s3 = scalar_lea.hbm %s3491_s2, %s2418_s23  ;;  %s342_s5 = sshll.u32 %s333_s16, 4  ;;  %s343_s5 = int_to_ptr.vmem [resolvable:$true] %s342_s5 }
  0x47   : > { %s340_s18 = sshll.u32 %s339_s3, 4  ;;  %s1519_s0 = sshll.u32 %s2271_s13, 1  ;;  %s341_s18 = int_to_ptr.hbm [resolvable:$true] %s340_s18 }
  0x48   : > { %1750 = dma.hbm_to_vmem [thread:$0]  (!%p2509_p1), %s298_s10, 128, %s300_s27, %s288_s24  }
  0x49   : > { %1756 = dma.hbm_to_vmem [thread:$0]  (!%p2435_p9), %s341_s18, 512, %s343_s5, %s2441_s7, %s3484_s6, %s3483_s1, %s3492_s26  }
  0x4a   : > { %s383_s23 = scalar_lea.hbm %s3384_s4, %s1519_s0  ;;  %s379_s3 = scalar_lea.vmem [#allocation10], %s1518_s8 }
  0x4b   : > { %s387_s2 = sshll.u32 %s379_s3, 4  ;;  %s385_s15 = sshll.u32 %s383_s23, 4  ;;  %s388_s2 = int_to_ptr.vmem [resolvable:$true] %s387_s2  ;;  %s386_s15 = int_to_ptr.hbm [resolvable:$true] %s385_s15 }
  0x4c   : > { %1762 = dma.hbm_to_vmem [thread:$0]  (!%p2509_p1), %s386_s15, 32, %s388_s2, %s2462_s17  }
  0x4d   : > { %396 = sbr.rel (%p2451_p12) target bundleno = 1156 (0x484), region = 40 }
  0x52   : > { %s398_s10 = sand.u32 1, %s2255_s9  }
  0x53   : > { %s1521_s25 = sshll.u32 %s398_s10, 3  ;;  %s399_s1 = scalar_lea.sflag [#allocation3], %s398_s10 }
  0x54   : > { %s402_s6 = scalar_lea.vmem [#allocation2], %s1521_s25 }
  0x55   : > { %2210 = dma.done.wait (%p2493_p7), %s399_s1, 128  }
  0x56   : > { %2212 = vsyncadd (%p2493_p7), %s399_s1, 4294967168  ;;  %s408_s0 = sand.u32 1, %s2471_s20   ;;  %s410_s29 = sand.u32 1, %s2243_s28  }
  0x57   : > { %s1522_s2 = sshll.u32 %s410_s29, 5  ;;  %s409_s15 = scalar_lea.sflag [#allocation6], %s408_s0 }
  0x58   : > { %s2542_s14 = scalar_lea.vmem [#allocation5], %s1522_s2 }
  0x59   : > { %2214 = dma.done.wait (%p2497_p8), %s409_s15, 1024  }
  0x5a   : > { %2216 = vsyncadd (%p2497_p8), %s409_s15, 4294966272  ;;  %s2548_s7 = scalar_lea.vmem [#allocation7], %s1522_s2  ;;  %s429_s17 = scalar_lea.sflag [#allocation9], %s408_s0 }
  0x5b   : > { %s2550_s19 = scalar_lea.vmem [#allocation8], %s1522_s2 }
  0x5c   : > { %2218 = dma.done.wait (%p2497_p8), %s429_s17, 512  }
  0x5d   : > { %2220 = vsyncadd (%p2497_p8), %s429_s17, 4294966784  ;;  %s1525_s22 = sshll.u32 %s398_s10, 1 }
  0x5e   : > { %s2556_s27 = scalar_lea.vmem [#allocation10], %s1525_s22 }
  0x5f   : > { %2222 = dma.done.wait (%p2493_p7), %s429_s17, 32  }
  0x60   : > { %2224 = vsyncadd (%p2493_p7), %s429_s17, 4294967264  ;;  %s3493_s18 = sld [smem:[#allocation27_spill]] }
  0x61   : > { %s3494_s24 = sld [smem:[#allocation26_spill]] }
  0x66   : > { %p497_p5 = scmp.eq.s32.totalorder %s3493_s18, 0 }
  0x67   : > { %p498_p9 = scmp.eq.s32.totalorder %s3494_s24, 0 }
  0x69   : > { %p499_p10 = pnand %p498_p9, %p497_p5 }
  0x6b   : > { %502 = sbr.rel (%p499_p10) target bundleno = 117 (0x75), region = 64 }
  0x70   : > { %v2284_v0 = vmov 0.0  }
  0x71   : > { %503 = vst [vmem:[#allocation11] sm:$0x1] %v2284_v0 }
  0x72   : > { %504 = vst [vmem:[#allocation12] sm:$0x1] %v2284_v0 }
  0x73   : > { %505 = vst [vmem:[#allocation14] sm:$0x7] %v2284_v0 }
  0x74   : > { %506 = vst [vmem:[#allocation15] sm:$0x1] %v2284_v0 }
  0x75 PF: > { %v2564_v1 = vld [vmem:[%s402_s6] sm:$0xff]  ;;  %vm3400_vm0 = vcmask 1042432   ;;  %v547_v11 = vlaneseq  ;;  %v1874_v17 = vld [vmem:[%s2556_s27] ss:$0 sm:$0xff]  ;;  %v3505_v30 = vmov 0  ;;  %v3508_v32 = vmov 0 }
  0x76   : > { %v508_v2 = vmul.f32 %v2564_v1, %v2564_v1  ;;  %vm3401_vm1 = vcmp.gt.f32.partialorder %v2564_v1, 0.0  ;;  %v3511_v33 = vmov 0  ;;  %v3514_v34 = vmov 0  ;;  %s3542_s21 = sld [smem:[#allocation27_spill]] }
  0x77   : > { %v2572_v12 = vshrl.u32 %v547_v11, 7  ;;  %v3517_v35 = vmov 0  ;;  %v3520_v36 = vmov 0  ;;  %v3522_v37 = vmov 0 }
  0x78   : > { %v510_v3 = vsel %vm3400_vm0, %v508_v2, 0.0  ;;  %v3524_v38 = vmov 0  ;;  %v3526_v40 = vmov 0  ;;  %v3528_v41 = vmov 0 }
  0x79   : > { %v511_v4 = vrot.slane %v510_v3, 4  ;;  %3495 = vst [vmem:[#allocation34_spill] sm:$0xff] %v2572_v12  ;;  %v2575_v13 = vadd.s32 8, %v2572_v12  ;;  %v2578_v14 = vadd.s32 16, %v2572_v12  ;;  %v2581_v15 = vadd.s32 24, %v2572_v12 }
  0x7a   : > { %v2584_v16 = vadd.s32 32, %v2572_v12  ;;  %v2588_v18 = vadd.s32 40, %v2572_v12  ;;  %v2591_v19 = vadd.s32 48, %v2572_v12  ;;  %v2594_v20 = vadd.s32 56, %v2572_v12 }
  0x7b   : > { %v512_v5 = vadd.f32 %v511_v4, %v510_v3  ;;  %3496 = vst [vmem:[#allocation35_spill] sm:$0xff] %v2575_v13  ;;  %v2597_v21 = vadd.s32 64, %v2572_v12  ;;  %v2600_v22 = vadd.s32 72, %v2572_v12  ;;  %v2603_v23 = vadd.s32 80, %v2572_v12 }
  0x7c   : > { %3497 = vst [vmem:[#allocation36_spill] sm:$0xff] %v2578_v14  ;;  %v2606_v24 = vadd.s32 88, %v2572_v12  ;;  %v2609_v25 = vadd.s32 96, %v2572_v12  ;;  %v2612_v27 = vadd.s32 104, %v2572_v12  ;;  %v2615_v28 = vadd.s32 112, %v2572_v12  ;;  %p1542_p11 = scmp.ne.s32.totalorder %s3542_s21, 0 }
  0x7d   : > { %v513_v6 = vrot.slane %v512_v5, 2  ;;  %3498 = vst [vmem:[#allocation37_spill] sm:$0xff] %v2581_v15  ;;  %v2618_v29 = vadd.s32 120, %v2572_v12  ;;  %vm2621_vm2 = vcmp.eq.s32.totalorder %v2572_v12, %v1874_v17  ;;  %vm2626_vm3 = vcmp.eq.s32.totalorder %v2575_v13, %v1874_v17 }
  0x7e   : > { %3499 = vst [vmem:[#allocation38_spill] sm:$0xff] %v2584_v16  ;;  %v3506_v30 = vsel %vm2621_vm2, 4294967295, %v3505_v30  ;;  %v3509_v32 = vsel %vm2626_vm3, 4294967295, %v3508_v32  ;;  %vm2631_vm4 = vcmp.eq.s32.totalorder %v2578_v14, %v1874_v17  ;;  %vm2636_vm5 = vcmp.eq.s32.totalorder %v2581_v15, %v1874_v17 }
  0x7f   : > { %v514_v7 = vadd.f32 %v513_v6, %v512_v5  ;;  %3500 = vst [vmem:[#allocation39_spill] sm:$0xff] %v2588_v18  ;;  %v3512_v33 = vsel %vm2631_vm4, 4294967295, %v3511_v33  ;;  %v3515_v34 = vsel %vm2636_vm5, 4294967295, %v3514_v34  ;;  %vm2641_vm6 = vcmp.eq.s32.totalorder %v2584_v16, %v1874_v17 }
  0x80   : > { %3501 = vst [vmem:[#allocation40_spill] sm:$0xff] %v2591_v19  ;;  %v3518_v35 = vsel %vm2641_vm6, 4294967295, %v3517_v35  ;;  %vm2646_vm7 = vcmp.eq.s32.totalorder %v2588_v18, %v1874_v17  ;;  %vm2651_vm8 = vcmp.eq.s32.totalorder %v2591_v19, %v1874_v17  ;;  %vm2656_vm9 = vcmp.eq.s32.totalorder %v2594_v20, %v1874_v17 }
  0x81   : > { %v515_v8 = vrot.slane %v514_v7, 1  ;;  %3502 = vst [vmem:[#allocation41_spill] sm:$0xff] %v2594_v20  ;;  %v3521_v36 = vsel %vm2646_vm7, 4294967295, %v3520_v36  ;;  %v3523_v37 = vsel %vm2651_vm8, 4294967295, %v3522_v37  ;;  %v3525_v38 = vsel %vm2656_vm9, 4294967295, %v3524_v38 }
  0x82   : > { %3503 = vst [vmem:[#allocation42_spill] sm:$0xff] %v2597_v21  ;;  %vm2661_vm10 = vcmp.eq.s32.totalorder %v2597_v21, %v1874_v17  ;;  %vm2666_vm11 = vcmp.eq.s32.totalorder %v2600_v22, %v1874_v17  ;;  %vm2671_vm12 = vcmp.eq.s32.totalorder %v2603_v23, %v1874_v17  ;;  %v3530_v42 = vmov 0 }
  0x83   : > { %v516_v9 = vadd.f32 %v515_v8, %v514_v7  ;;  %3504 = vst [vmem:[#allocation43_spill] sm:$0xff] %v2600_v22  ;;  %v3527_v40 = vsel %vm2661_vm10, 4294967295, %v3526_v40  ;;  %v3529_v41 = vsel %vm2666_vm11, 4294967295, %v3528_v41  ;;  %v3531_v42 = vsel %vm2671_vm12, 4294967295, %v3530_v42 }
  0x84   : > { %3507 = vst [vmem:[#allocation44_spill] sm:$0xff] %v3506_v30  ;;  %vm2676_vm13 = vcmp.eq.s32.totalorder %v2606_v24, %v1874_v17  ;;  %v3532_v43 = vmov 0  ;;  %vm2681_vm14 = vcmp.eq.s32.totalorder %v2609_v25, %v1874_v17  ;;  %vm2686_vm15 = vcmp.eq.s32.totalorder %v2612_v27, %v1874_v17 }
  0x85   : > { %v518_v10 = vsel %vm3401_vm1, %v516_v9, 1.0  ;;  %3510 = vst [vmem:[#allocation45_spill] sm:$0xff] %v3509_v32  ;;  %v3533_v43 = vsel %vm2676_vm13, 4294967295, %v3532_v43  ;;  %vm2691_vm0 = vcmp.eq.s32.totalorder %v2615_v28, %v1874_v17  ;;  %vm2696_vm1 = vcmp.eq.s32.totalorder %v2618_v29, %v1874_v17 }
  0x86   : > { %1875 = vrsqrt.f32 %v518_v10  ;;  %3513 = vst [vmem:[#allocation46_spill] sm:$0xff] %v3512_v33  ;;  %vm526_vm2 = vcmp.eq.f32.partialorder %v518_v10, inf  ;;  %v529_v51 = vand.u32 2147483648, %v518_v10  ;;  %vm528_vm3 = vcmp.eq.f32.partialorder %v518_v10, 0.0 }
  0x87   : > { %3516 = vst [vmem:[#allocation47_spill] sm:$0xff] %v3515_v34 }
  0x88   : > { %3519 = vst [vmem:[#allocation48_spill] sm:$0xff] %v3518_v35 }
  0x8c   : > { %v1876_v26 = vpop.eup %1875 }
  0x8d   : > { %v520_v31 = vmul.f32 %v1876_v26, %v518_v10 }
  0x8f   : > { %v521_v39 = vmul.f32 %v1876_v26, %v520_v31 }
  0x91   : > { %v522_v47 = vmul.f32 0.5, %v521_v39 }
  0x93   : > { %v523_v49 = vsub.f32 1.5, %v522_v47 }
  0x95   : > { %v524_v50 = vmul.f32 %v1876_v26, %v523_v49 }
  0x97   : > { %v525_v52 = vmul.f32 %v524_v50, %v518_v10 }
  0x99   : > { %v527_v53 = vsel %vm526_vm2, %v518_v10, %v525_v52 }
  0x9a   : > { %v2700_v54 = vsel %vm528_vm3, %v529_v51, %v527_v53 }
  0x9b   : > { %1877 = vrcp.f32 %v2700_v54  ;;  %v542_v57 = vand.u32 2147483648, %v2700_v54  ;;  %vm536_vm4 = vweird.f32 %v2700_v54  ;;  %v540_v59 = vand.u32 2147483647, %v2700_v54 }
  0x9d   : > { %v543_v61 = vor.u32 1.1754944e-38, %v542_v57  ;;  %vm541_vm2 = vcmp.eq.f32.partialorder %v540_v59, 8.507059e+37 }
  0xa1   : > { %v1878_v55 = vpop.eup %1877 }
  0xa2   : > { %v532_v56 = vmul.f32 %v1878_v55, %v2700_v54  ;;  %vm537_vm5 = vweird.f32 %v1878_v55 }
  0xa3   : > { %vm538_vm6 = vmor %vm536_vm4, %vm537_vm5 }
  0xa4   : > { %v533_v58 = vsub.f32 1.0, %v532_v56 }
  0xa6   : > { %v534_v60 = vmul.f32 %v1878_v55, %v533_v58 }
  0xa7   : > { %615 = sbr.rel (%p1542_p11) target bundleno = 365 (0x16d), region = 68 }
  0xa8   : > { %v535_v62 = vadd.f32 %v1878_v55, %v534_v60 }
  0xaa   : > { %v539_v63 = vsel %vm538_vm6, %v1878_v55, %v535_v62 }
  0xab   : > { %v2707_v0 = vsel %vm541_vm2, %v543_v61, %v539_v63 }
  0xac   : > { %v620_v2 = vrot.slane %v2707_v0, 3  ;;  %v2285_v3 = vmov 1.0   ;;  %vm3543_vm5 = vnez %v3518_v35  ;;  %vm616_vm6 = vcmp.le.f32.partialorder %v2700_v54, 21.167088  ;;  %v646_v58 = vld [vmem:[#allocation11] sm:$0x1] }
  0xad   : > { %1544 = vmatpush.xpose.msk.msra.mxu0 %vm2696_vm1, %v2285_v3  ;;  %v2286_v52 = vmov 0.0  }
  0xae   : > { %v622_v4 = vmul.f32 %v620_v2, %v2564_v1 }
  0xb0   : > { %v1543_v5 = vadd.f32 -1.0, %v622_v4 }
  0xb1   : > { %1545 = vmatpush.xpose.msk.msra.mxu0 %vm2691_vm0, %v2285_v3 }
  0xb2   : > { %v624_v6 = vmul.f32 -16.0, %v1543_v5 }
  0xb4   : > { %v625_v7 = vmul.f32 1.442695, %v624_v6 }
  0xb5   : > { %1546 = vmatpush.xpose.msk.msra.mxu0 %vm2686_vm15, %v2285_v3 }
  0xb6   : > { %1879 = vpow2.f32 %v625_v7 }
  0xb9   : > { %1547 = vmatpush.xpose.msk.msra.mxu0 %vm2681_vm14, %v2285_v3 }
  0xbc   : > { %v1880_v8 = vpop.eup %1879 }
  0xbd   : > { %1548 = vmatpush.xpose.msk.msra.mxu0 %vm2676_vm13, %v2285_v3  ;;  %v627_v9 = vadd.f32 1.0, %v1880_v8 }
  0xbf   : > { %v629_v10 = vrot.slane %v627_v9, 5 }
  0xc1   : > { %1549 = vmatpush.xpose.msk.msra.mxu0 %vm2671_vm12, %v2285_v3  ;;  %1881 = vrcp.f32 %v629_v10  ;;  %vm636_vm3 = vweird.f32 %v629_v10  ;;  %v642_v39 = vand.u32 2147483648, %v629_v10  ;;  %v640_v49 = vand.u32 2147483647, %v629_v10 }
  0xc3   : > { %v643_v50 = vor.u32 1.1754944e-38, %v642_v39 }
  0xc5   : > { %1550 = vmatpush.xpose.msk.msra.mxu0 %vm2666_vm11, %v2285_v3  ;;  %vm3546_vm11 = vnez %v3512_v33 }
  0xc7   : > { %v1882_v11 = vpop.eup %1881 }
  0xc8   : > { %v632_v17 = vmul.f32 %v1882_v11, %v629_v10  ;;  %vm637_vm4 = vweird.f32 %v1882_v11 }
  0xc9   : > { %1551 = vmatpush.xpose.msk.msra.mxu0 %vm2661_vm10, %v2285_v3  ;;  %vm638_vm2 = vmor %vm636_vm3, %vm637_vm4  ;;  %vm3548_vm3 = vnez %v3506_v30 }
  0xca   : > { %v633_v26 = vsub.f32 1.0, %v632_v17 }
  0xcc   : > { %v634_v31 = vmul.f32 %v1882_v11, %v633_v26 }
  0xcd   : > { %1552 = vmatpush.xpose.msk.msra.mxu0 %vm2656_vm9, %v2285_v3  ;;  %vm3544_vm9 = vnez %v3515_v34 }
  0xce   : > { %v635_v47 = vadd.f32 %v1882_v11, %v634_v31 }
  0xd0   : > { %v639_v51 = vsel %vm638_vm2, %v1882_v11, %v635_v47 }
  0xd1   : > { %1553 = vmatpush.xpose.msk.msra.mxu0 %vm2651_vm8, %v2285_v3  ;;  %vm3545_vm8 = vcmp.gt.f32.partialorder %v2564_v1, 0.0 }
  0xd2   : > { %vm617_vm10 = vmand %vm616_vm6, %vm3545_vm8 }
  0xd3   : > { %v618_v53 = vsel %vm617_vm10, 1.0, %v2286_v52 }
  0xd5   : > { %1554 = vmatpush.xpose.msk.msra.mxu0 %vm2646_vm7, %v2285_v3  ;;  %vm641_vm7 = vcmp.eq.f32.partialorder %v640_v49, 8.507059e+37 }
  0xd6   : > { %v644_v55 = vsel %vm641_vm7, %v643_v50, %v639_v51 }
  0xd7   : > { %v645_v56 = vmul.f32 %v644_v55, %v618_v53 }
  0xd9   : > { %1555 = vmatpush.xpose.msk.msra.mxu0 %vm3543_vm5, %v2285_v3  ;;  %vm3547_vm5 = vnez %v3509_v32  ;;  %v648_v57 = vrot.slane %v645_v56, 6 }
  0xdd   : > { %1556 = vmatpush.xpose.msk.msra.mxu0 %vm3544_vm9, %v2285_v3 }
  0xe1   : > { %1557 = vmatpush.xpose.msk.msra.mxu0 %vm3546_vm11, %v2285_v3 }
  0xe5   : > { %1558 = vmatpush.xpose.msk.msra.mxu0 %vm3547_vm5, %v2285_v3 }
  0xe9   : > { %1559 = vmatpush.xpose.msk.msra.mxu0 %vm3548_vm3, %v2285_v3 }
  0xec   : > { %666 = vmatmul.f32.vlgmr.msra.gmra.mxu0 %v648_v57 }
 0x169   : > { %v667_v59 = vpop.f32.mrf.mxu0 }
 0x16a   : > { %v670_v60 = vadd.f32 %v667_v59, %v646_v58 }
 0x16c   : > { %671 = vst [vmem:[#allocation11] sm:$0x1] %v670_v60 }
 0x16d PF: > { %s3549_s30 = sld [smem:[#allocation27_spill]] }
 0x173   : > { %p1560_p12 = scmp.ne.s32.totalorder %s3549_s30, 1 }
 0x175   : > { %675 = sbr.rel (%p1560_p12) target bundleno = 818 (0x332), region = 72 }
 0x17a   : > { %v2749_v61 = vld [vmem:[%s2556_s27 + $0x1] ss:$0 sm:$0xff]  ;;  %v2287_v62 = vmov 1.0   ;;  %vm3550_vm2 = vnez %v3529_v41  ;;  %vm3551_vm3 = vnez %v3527_v40  ;;  %v726_v63 = vld [vmem:[#allocation11] sm:$0x1]  ;;  %v2999_v4 = vld [vmem:[%s2548_s7 + $0x8] sm:$0xff] }
 0x17b   : > { %1577 = vmatpush.msk.msra.mxu0 %vm2696_vm1, %v2287_v62  ;;  %1611 = vmatpush.xpose.msk.msra.mxu2 %vm2696_vm1, %v2287_v62  ;;  %vm693_vm7 = vcmp.eq.s32.totalorder %v2618_v29, %v2749_v61  ;;  %vm692_vm8 = vcmp.eq.s32.totalorder %v2615_v28, %v2749_v61  ;;  %vm691_vm9 = vcmp.eq.s32.totalorder %v2612_v27, %v2749_v61  ;;  %v2996_v3 = vld [vmem:[%s2548_s7] sm:$0xff]  ;;  %v3002_v5 = vld [vmem:[%s2548_s7 + $0x10] sm:$0xff]  ;;  %v3007_v7 = vld [vmem:[%s2548_s7 + $0x18] sm:$0x1] }
 0x17c   : > { %1593 = vmatpush.msk.msra.mxu1 %vm693_vm7, %v2287_v62  ;;  %1627 = vmatpush.xpose.msk.msra.mxu3 %vm693_vm7, %v2287_v62  ;;  %vm690_vm10 = vcmp.eq.s32.totalorder %v2609_v25, %v2749_v61  ;;  %vm689_vm11 = vcmp.eq.s32.totalorder %v2606_v24, %v2749_v61  ;;  %vm688_vm4 = vcmp.eq.s32.totalorder %v2603_v23, %v2749_v61  ;;  %v3010_v9 = vld [vmem:[%s2550_s19] sm:$0xff]  ;;  %v3015_v11 = vld [vmem:[%s2550_s19 + $0x8] sm:$0xff]  ;;  %v3018_v17 = vld [vmem:[%s2550_s19 + $0x10] sm:$0xff] }
 0x17d   : > { %1578 = vmatpush.msk.msra.mxu0 %vm2691_vm0, %v2287_v62  ;;  %vm3429_vm6 = vcmp.eq.s32.totalorder %v2600_v22, %v2749_v61  ;;  %vm3427_vm5 = vcmp.eq.s32.totalorder %v2597_v21, %v2749_v61  ;;  %vm3428_vm7 = vcmp.eq.s32.totalorder %v2594_v20, %v2749_v61  ;;  %v3021_v26 = vld [vmem:[%s2550_s19 + $0x18] sm:$0x1] }
 0x17e   : > { %1594 = vmatpush.msk.msra.mxu1 %vm692_vm8, %v2287_v62 }
 0x17f   : > { %1579 = vmatpush.msk.msra.mxu0 %vm2686_vm15, %v2287_v62  ;;  %1612 = vmatpush.xpose.msk.msra.mxu2 %vm2691_vm0, %v2287_v62 }
 0x180   : > { %1595 = vmatpush.msk.msra.mxu1 %vm691_vm9, %v2287_v62  ;;  %1628 = vmatpush.xpose.msk.msra.mxu3 %vm692_vm8, %v2287_v62  ;;  %vm3552_vm8 = vnez %v3525_v38 }
 0x181   : > { %1580 = vmatpush.msk.msra.mxu0 %vm2681_vm14, %v2287_v62 }
 0x182   : > { %1596 = vmatpush.msk.msra.mxu1 %vm690_vm10, %v2287_v62 }
 0x183   : > { %1581 = vmatpush.msk.msra.mxu0 %vm2676_vm13, %v2287_v62  ;;  %1613 = vmatpush.xpose.msk.msra.mxu2 %vm2686_vm15, %v2287_v62 }
 0x184   : > { %1597 = vmatpush.msk.msra.mxu1 %vm689_vm11, %v2287_v62  ;;  %1629 = vmatpush.xpose.msk.msra.mxu3 %vm691_vm9, %v2287_v62  ;;  %vm3430_vm9 = vcmp.eq.s32.totalorder %v2591_v19, %v2749_v61 }
 0x185   : > { %1582 = vmatpush.msk.msra.mxu0 %vm2671_vm12, %v2287_v62 }
 0x186   : > { %1598 = vmatpush.msk.msra.mxu1 %vm688_vm4, %v2287_v62 }
 0x187   : > { %1583 = vmatpush.msk.msra.mxu0 %vm3550_vm2, %v2287_v62  ;;  %1614 = vmatpush.xpose.msk.msra.mxu2 %vm2681_vm14, %v2287_v62 }
 0x188   : > { %1599 = vmatpush.msk.msra.mxu1 %vm3429_vm6, %v2287_v62  ;;  %1630 = vmatpush.xpose.msk.msra.mxu3 %vm690_vm10, %v2287_v62  ;;  %vm3553_vm10 = vnez %v3523_v37  ;;  %vm3434_vm6 = vcmp.eq.s32.totalorder %v2584_v16, %v2749_v61 }
 0x189   : > { %1584 = vmatpush.msk.msra.mxu0 %vm3551_vm3, %v2287_v62 }
 0x18a   : > { %1600 = vmatpush.msk.msra.mxu1 %vm3427_vm5, %v2287_v62  ;;  %vm3431_vm5 = vcmp.eq.s32.totalorder %v2588_v18, %v2749_v61 }
 0x18b   : > { %1585 = vmatpush.msk.msra.mxu0 %vm3552_vm8, %v2287_v62  ;;  %1615 = vmatpush.xpose.msk.msra.mxu2 %vm2676_vm13, %v2287_v62  ;;  %vm678_vm13 = vcmp.eq.s32.totalorder %v2572_v12, %v2749_v61 }
 0x18c   : > { %1601 = vmatpush.msk.msra.mxu1 %vm3428_vm7, %v2287_v62  ;;  %1631 = vmatpush.xpose.msk.msra.mxu3 %vm689_vm11, %v2287_v62  ;;  %vm3554_vm7 = vnez %v3521_v36  ;;  %vm3555_vm11 = vnez %v3518_v35 }
 0x18d   : > { %1586 = vmatpush.msk.msra.mxu0 %vm3553_vm10, %v2287_v62 }
 0x18e   : > { %1602 = vmatpush.msk.msra.mxu1 %vm3430_vm9, %v2287_v62  ;;  %vm3435_vm9 = vcmp.eq.s32.totalorder %v2581_v15, %v2749_v61 }
 0x18f   : > { %1587 = vmatpush.msk.msra.mxu0 %vm3554_vm7, %v2287_v62  ;;  %1616 = vmatpush.xpose.msk.msra.mxu2 %vm2671_vm12, %v2287_v62  ;;  %vm3558_vm12 = vcmp.eq.s32.totalorder %v2600_v22, %v2749_v61 }
 0x190   : > { %1603 = vmatpush.msk.msra.mxu1 %vm3431_vm5, %v2287_v62  ;;  %1632 = vmatpush.xpose.msk.msra.mxu3 %vm688_vm4, %v2287_v62  ;;  %vm3556_vm5 = vnez %v3515_v34  ;;  %vm3557_vm4 = vnez %v3512_v33 }
 0x191   : > { %1588 = vmatpush.msk.msra.mxu0 %vm3555_vm11, %v2287_v62 }
 0x192   : > { %1604 = vmatpush.msk.msra.mxu1 %vm3434_vm6, %v2287_v62  ;;  %vm679_vm6 = vcmp.eq.s32.totalorder %v2575_v13, %v2749_v61 }
 0x193   : > { %1589 = vmatpush.msk.msra.mxu0 %vm3556_vm5, %v2287_v62  ;;  %1617 = vmatpush.xpose.msk.msra.mxu2 %vm3550_vm2, %v2287_v62  ;;  %vm3559_vm2 = vcmp.eq.s32.totalorder %v2578_v14, %v2749_v61 }
 0x194   : > { %1605 = vmatpush.msk.msra.mxu1 %vm3435_vm9, %v2287_v62  ;;  %1633 = vmatpush.xpose.msk.msra.mxu3 %vm3558_vm12, %v2287_v62  ;;  %vm3560_vm9 = vnez %v3509_v32  ;;  %vm3561_vm12 = vnez %v3506_v30 }
 0x195   : > { %1590 = vmatpush.msk.msra.mxu0 %vm3557_vm4, %v2287_v62 }
 0x196   : > { %1606 = vmatpush.msk.msra.mxu1 %vm3559_vm2, %v2287_v62  ;;  %vm3562_vm2 = vcmp.eq.s32.totalorder %v2597_v21, %v2749_v61 }
 0x197   : > { %1591 = vmatpush.msk.msra.mxu0 %vm3560_vm9, %v2287_v62  ;;  %1618 = vmatpush.xpose.msk.msra.mxu2 %vm3551_vm3, %v2287_v62  ;;  %vm3563_vm3 = vcmp.eq.s32.totalorder %v2594_v20, %v2749_v61 }
 0x198   : > { %1607 = vmatpush.msk.msra.mxu1 %vm679_vm6, %v2287_v62  ;;  %1634 = vmatpush.xpose.msk.msra.mxu3 %vm3562_vm2, %v2287_v62  ;;  %vm3564_vm2 = vcmp.eq.s32.totalorder %v2591_v19, %v2749_v61 }
 0x199   : > { %1592 = vmatpush.msk.msra.mxu0 %vm3561_vm12, %v2287_v62 }
 0x19a   : > { %743 = vmatmul.f32.vlgmr.msra.gmra.mxu0 %v726_v63  ;;  %1608 = vmatpush.msk.msra.mxu1 %vm678_vm13, %v2287_v62 }
 0x19b   : > { %763 = vmatmul.f32.vlgmr.msra.gmra.mxu1 %v726_v63  ;;  %1619 = vmatpush.xpose.msk.msra.mxu2 %vm3552_vm8, %v2287_v62  ;;  %vm3565_vm8 = vcmp.eq.s32.totalorder %v2588_v18, %v2749_v61 }
 0x19c   : > { %1635 = vmatpush.xpose.msk.msra.mxu3 %vm3563_vm3, %v2287_v62 }
 0x19f   : > { %1620 = vmatpush.xpose.msk.msra.mxu2 %vm3553_vm10, %v2287_v62  ;;  %vm3566_vm10 = vcmp.eq.s32.totalorder %v2584_v16, %v2749_v61 }
 0x1a0   : > { %1636 = vmatpush.xpose.msk.msra.mxu3 %vm3564_vm2, %v2287_v62 }
 0x1a3   : > { %1621 = vmatpush.xpose.msk.msra.mxu2 %vm3554_vm7, %v2287_v62  ;;  %vm3567_vm7 = vcmp.eq.s32.totalorder %v2581_v15, %v2749_v61 }
 0x1a4   : > { %1637 = vmatpush.xpose.msk.msra.mxu3 %vm3565_vm8, %v2287_v62 }
 0x1a7   : > { %1622 = vmatpush.xpose.msk.msra.mxu2 %vm3555_vm11, %v2287_v62  ;;  %vm3568_vm11 = vcmp.eq.s32.totalorder %v2578_v14, %v2749_v61 }
 0x1a8   : > { %1638 = vmatpush.xpose.msk.msra.mxu3 %vm3566_vm10, %v2287_v62 }
 0x1ab   : > { %1623 = vmatpush.xpose.msk.msra.mxu2 %vm3556_vm5, %v2287_v62 }
 0x1ac   : > { %1639 = vmatpush.xpose.msk.msra.mxu3 %vm3567_vm7, %v2287_v62 }
 0x1af   : > { %1624 = vmatpush.xpose.msk.msra.mxu2 %vm3557_vm4, %v2287_v62  ;;  %vm823_vm4 = vcmask 1040384  }
 0x1b0   : > { %1640 = vmatpush.xpose.msk.msra.mxu3 %vm3568_vm11, %v2287_v62 }
 0x1b3   : > { %1625 = vmatpush.xpose.msk.msra.mxu2 %vm3560_vm9, %v2287_v62 }
 0x1b4   : > { %1641 = vmatpush.xpose.msk.msra.mxu3 %vm679_vm6, %v2287_v62 }
 0x1b7   : > { %1626 = vmatpush.xpose.msk.msra.mxu2 %vm3561_vm12, %v2287_v62 }
 0x1b8   : > { %1642 = vmatpush.xpose.msk.msra.mxu3 %vm678_vm13, %v2287_v62 }
 0x217   : > { %v744_v2 = vpop.f32.mrf.mxu0 }
 0x218   : > { %v3004_v6 = vperm.slane %v744_v2, 0  ;;  %v764_v8 = vpop.f32.mrf.mxu1 }
 0x219   : > { %v3012_v10 = vperm.slane %v764_v8, 0 }
 0x21a   : > { %v780_v31 = vsub.f32 %v2996_v3, %v3004_v6  ;;  %v781_v39 = vsub.f32 %v2999_v4, %v3004_v6  ;;  %v782_v47 = vsub.f32 %v3002_v5, %v3004_v6  ;;  %v783_v49 = vsub.f32 %v3007_v7, %v3004_v6 }
 0x21b   : > { %v789_v57 = vsub.f32 %v3010_v9, %v3012_v10  ;;  %v790_v59 = vsub.f32 %v3015_v11, %v3012_v10  ;;  %v791_v60 = vsub.f32 %v3018_v17, %v3012_v10  ;;  %v792_v61 = vsub.f32 %v3021_v26, %v3012_v10 }
 0x21c   : > { %v784_v53 = vmul.f32 %v780_v31, %v780_v31  ;;  %v785_v55 = vmul.f32 %v781_v39, %v781_v39  ;;  %v786_v56 = vmul.f32 %v782_v47, %v782_v47  ;;  %v787_v58 = vmul.f32 %v783_v49, %v783_v49  ;;  %v3056_v49 = vld [vmem:[%s2542_s14] sm:$0xff] }
 0x21d   : > { %v793_v62 = vmul.f32 %v789_v57, %v789_v57  ;;  %v794_v31 = vmul.f32 %v790_v59, %v790_v59  ;;  %v795_v39 = vmul.f32 %v791_v60, %v791_v60  ;;  %v796_v47 = vmul.f32 %v792_v61, %v792_v61 }
 0x21e   : > { %vm801_vm13 = vcmp.gt.f32.partialorder %v3056_v49, 0.0 }
 0x21f   : > { %v797_v52 = vadd.f32 %v793_v62, %v784_v53  ;;  %v798_v51 = vadd.f32 %v794_v31, %v785_v55  ;;  %v799_v63 = vadd.f32 %v795_v39, %v786_v56  ;;  %v800_v50 = vadd.f32 %v796_v47, %v787_v58  ;;  %v3060_v62 = vld [vmem:[%s2542_s14 + $0x8] sm:$0xff] }
 0x220   : > { %v3441_v53 = vrot.slane %v2707_v0, 2  ;;  %vm802_vm6 = vcmp.gt.f32.partialorder %v3060_v62, 0.0 }
 0x221   : > { %v805_v12 = vmul.f32 -4.0, %v797_v52  ;;  %v806_v2 = vmul.f32 -4.0, %v798_v51  ;;  %v807_v8 = vmul.f32 -4.0, %v799_v63  ;;  %v808_v59 = vmul.f32 -4.0, %v800_v50  ;;  %v3066_v52 = vld [vmem:[%s2542_s14 + $0x10] sm:$0xff] }
 0x222   : > { %v876_v51 = vmul.f32 %v3441_v53, %v2564_v1  ;;  %vm803_vm5 = vcmp.gt.f32.partialorder %v3066_v52, 0.0 }
 0x223   : > { %v809_v60 = vmul.f32 1.442695, %v805_v12  ;;  %v811_v61 = vmul.f32 1.442695, %v806_v2  ;;  %v813_v13 = vmul.f32 1.442695, %v807_v8 }
 0x224   : > { %v815_v14 = vmul.f32 1.442695, %v808_v59  ;;  %v3069_v12 = vld [vmem:[%s2542_s14 + $0x18] sm:$0x1]  ;;  %v877_v50 = vmul.f32 %v876_v51, %v876_v51 }
 0x225   : > { %1884 = vpow2.f32 %v809_v60  ;;  %vm804_vm9 = vcmp.gt.f32.partialorder %v3069_v12, 0.0 }
 0x226   : > { %1886 = vpow2.f32 %v811_v61 }
 0x227   : > { %1888 = vpow2.f32 %v813_v13 }
 0x228   : > { %1890 = vpow2.f32 %v815_v14  ;;  %v878_v14 = vmul.f32 %v877_v50, %v877_v50 }
 0x22a   : > { %v879_v47 = vmul.f32 %v878_v14, %v878_v14 }
 0x22b   : > { %v1885_v55 = vpop.eup %1884 }
 0x22c   : > { %v1887_v56 = vpop.eup %1886  ;;  %v817_v13 = vsel %vm801_vm13, %v1885_v55, 0.0  ;;  %v880_v51 = vmul.f32 %v879_v47, %v878_v14  ;;  %v3076_v18 = vmul.f32 %v879_v47, %v879_v47 }
 0x22d   : > { %v1889_v58 = vpop.eup %1888  ;;  %v818_v63 = vsel %vm802_vm6, %v1887_v56, 0.0 }
 0x22e   : > { %v1891_v2 = vpop.eup %1890  ;;  %v821_v8 = vadd.f32 %v818_v63, %v817_v13  ;;  %v819_v31 = vsel %vm803_vm5, %v1889_v58, 0.0  ;;  %v881_v15 = vmul.f32 %v880_v51, %v877_v50  ;;  %v901_v20 = vmul.f32 6.0, %v3076_v18 }
 0x22f   : > { %v820_v39 = vsel %vm804_vm9, %v1891_v2, 0.0 }
 0x230   : > { %v822_v59 = vadd.f32 %v821_v8, %v819_v31  ;;  %v824_v60 = vsel %vm823_vm4, %v820_v39, 0.0  ;;  %v3078_v19 = vmul.f32 15.633927, %v881_v15  ;;  %v902_v30 = vadd.f32 1.0, %v901_v20 }
 0x232   : > { %v825_v61 = vadd.f32 %v824_v60, %v822_v59  ;;  %v884_v2 = vmul.f32 6.0, %v3078_v19  ;;  %vm908_vm7 = vweird.f32 %v902_v30 }
 0x234   : > { %v826_v53 = vrot.slane %v825_v61, 4  ;;  %v885_v14 = vadd.f32 1.0, %v884_v2 }
 0x236   : > { %v827_v57 = vadd.f32 %v826_v53, %v825_v61  ;;  %vm891_vm13 = vweird.f32 %v885_v14 }
 0x238   : > { %v828_v16 = vrot.slane %v827_v57, 2 }
 0x23a   : > { %v829_v55 = vadd.f32 %v828_v16, %v827_v57 }
 0x23c   : > { %v830_v56 = vrot.slane %v829_v55, 1 }
 0x23e   : > { %v831_v58 = vadd.f32 %v830_v56, %v829_v55 }
 0x240   : > { %vm832_vm12 = vcmp.gt.f32.partialorder %v831_v58, 0.0 }
 0x241   : > { %v833_v8 = vsel %vm832_vm12, %v831_v58, 1.0 }
 0x242   : > { %1892 = vrcp.f32 %v833_v8  ;;  %v845_v16 = vand.u32 2147483648, %v833_v8  ;;  %v843_v60 = vand.u32 2147483647, %v833_v8  ;;  %vm839_vm2 = vweird.f32 %v833_v8 }
 0x243   : > { %1894 = vrcp.f32 %v902_v30 }
 0x244   : > { %1896 = vrcp.f32 %v885_v14  ;;  %v846_v55 = vor.u32 1.1754944e-38, %v845_v16  ;;  %vm844_vm10 = vcmp.eq.f32.partialorder %v843_v60, 8.507059e+37 }
 0x248   : > { %v1893_v53 = vpop.eup %1892 }
 0x249   : > { %v835_v50 = vmul.f32 %v1893_v53, %v833_v8  ;;  %v1895_v47 = vpop.eup %1894  ;;  %vm840_vm3 = vweird.f32 %v1893_v53 }
 0x24a   : > { %v1897_v15 = vpop.eup %1896  ;;  %v904_v61 = vmul.f32 %v1895_v47, %v902_v30  ;;  %vm841_vm8 = vmor %vm839_vm2, %vm840_vm3  ;;  %vm909_vm11 = vweird.f32 %v1895_v47  ;;  %vm918_vm2 = vcmp.le.f32.partialorder %v2700_v54, 50.271835 }
 0x24b   : > { %v836_v59 = vsub.f32 1.0, %v835_v50  ;;  %v887_v56 = vmul.f32 %v1897_v15, %v885_v14  ;;  %vm892_vm6 = vweird.f32 %v1897_v15  ;;  %vm3096_vm5 = vmor %vm908_vm7, %vm909_vm11 }
 0x24c   : > { %v905_v2 = vsub.f32 1.0, %v904_v61  ;;  %vm3100_vm9 = vmor %vm891_vm13, %vm892_vm6 }
 0x24d   : > { %v837_v57 = vmul.f32 %v1893_v53, %v836_v59  ;;  %v888_v59 = vsub.f32 1.0, %v887_v56  ;;  %v897_v56 = vand.u32 2147483648, %v885_v14 }
 0x24f   : > { %v838_v51 = vadd.f32 %v1893_v53, %v837_v57  ;;  %v889_v60 = vmul.f32 %v1897_v15, %v888_v59 }
 0x251   : > { %v842_v20 = vsel %vm841_vm8, %v1893_v53, %v838_v51  ;;  %v906_v53 = vmul.f32 %v1895_v47, %v905_v2  ;;  %v912_v51 = vand.u32 2147483647, %v902_v30  ;;  %v895_v2 = vand.u32 2147483647, %v885_v14 }
 0x252   : > { %v847_v58 = vsel %vm844_vm10, %v846_v55, %v842_v20  ;;  %v967_v14 = vmul.f32 96.0, %v3076_v18  ;;  %vm3573_vm8 = vcmp.gt.f32.partialorder %v2564_v1, 0.0 }
 0x253   : > { %v3082_v21 = vmul.f32 %v847_v58, %v817_v13  ;;  %v3084_v32 = vmul.f32 %v847_v58, %v818_v63  ;;  %v3086_v50 = vmul.f32 %v847_v58, %v819_v31  ;;  %v852_v33 = vmul.f32 %v847_v58, %v820_v39  ;;  %vm919_vm10 = vmand %vm918_vm2, %vm3573_vm8 }
 0x254   : > { %v914_v31 = vand.u32 2147483648, %v902_v30  ;;  %v907_v61 = vadd.f32 %v1895_v47, %v906_v53  ;;  %v890_v58 = vadd.f32 %v1897_v15, %v889_v60  ;;  %vm913_vm12 = vcmp.eq.f32.partialorder %v912_v51, 8.507059e+37 }
 0x255   : > { %v853_v22 = vmul.f32 %v3082_v21, %v3056_v49  ;;  %v854_v8 = vmul.f32 %v3084_v32, %v3060_v62  ;;  %v856_v16 = vmul.f32 %v852_v33, %v3069_v12  ;;  %v855_v57 = vmul.f32 %v3086_v50, %v3066_v52 }
 0x256   : > { %v911_v30 = vsel %vm3096_vm5, %v1895_v47, %v907_v61  ;;  %vm896_vm3 = vcmp.eq.f32.partialorder %v895_v2, 8.507059e+37 }
 0x257   : > { %v857_v13 = vadd.f32 %v854_v8, %v853_v22  ;;  %v859_v39 = vsel %vm823_vm4, %v856_v16, 0.0  ;;  %v915_v8 = vor.u32 1.1754944e-38, %v914_v31  ;;  %v869_v16 = vmul.f32 %v2707_v0, %v2707_v0 }
 0x258   : > { %v961_v31 = vmul.f32 84.0, %v3078_v19 }
 0x259   : > { %v858_v63 = vadd.f32 %v857_v13, %v855_v57  ;;  %v898_v57 = vor.u32 1.1754944e-38, %v897_v56  ;;  %v894_v13 = vsel %vm3100_vm9, %v1897_v15, %v890_v58  ;;  %v2288_v56 = vmov 0.0  }
 0x25a   : > { %v920_v18 = vsel %vm919_vm10, 1.0, %v2288_v56 }
 0x25b   : > { %v860_v55 = vadd.f32 %v859_v39, %v858_v63  ;;  %v916_v63 = vsel %vm913_vm12, %v915_v8, %v911_v30  ;;  %v870_v39 = vmul.f32 %v869_v16, %v869_v16  ;;  %v899_v35 = vsel %vm896_vm3, %v898_v57, %v894_v13 }
 0x25c   : > { %v968_v20 = vmul.f32 %v967_v14, %v916_v63  ;;  %v962_v51 = vmul.f32 %v961_v31, %v899_v35  ;;  %v929_v8 = vrot.slane %v916_v63, 7 }
 0x25d   : > { %v861_v22 = vrot.slane %v860_v55, 4  ;;  %v871_v61 = vmul.f32 %v870_v39, %v869_v16  ;;  %v985_v39 = vmul.f32 1.083, %v2564_v1 }
 0x25e   : > { %v1610_v58 = vadd.f32 -8.0, %v968_v20  ;;  %v1609_v30 = vadd.f32 -6.0, %v962_v51 }
 0x25f   : > { %v862_v53 = vadd.f32 %v861_v22, %v860_v55  ;;  %v872_v55 = vmul.f32 %v871_v61, %v869_v16 }
 0x260   : > { %v971_v20 = vrot.slane %v1610_v58, 7  ;;  %v3577_v58 = vsub.f32 %v3012_v10, %v3015_v11 }
 0x261   : > { %v863_v60 = vrot.slane %v862_v53, 2  ;;  %v933_v63 = vrot.slane %v872_v55, 1  ;;  %v3576_v55 = vsub.f32 %v3004_v6, %v2999_v4 }
 0x263   : > { %v864_v34 = vadd.f32 %v863_v60, %v862_v53  ;;  %v924_v60 = vrot.slane %v871_v61, 2  ;;  %v3575_v61 = vsub.f32 %v3012_v10, %v3010_v9  ;;  %v3579_v9 = vsub.f32 %v3004_v6, %v3007_v7 }
 0x265   : > { %v865_v47 = vrot.slane %v864_v34, 1 }
 0x267   : > { %v866_v15 = vadd.f32 %v865_v47, %v864_v34 }
 0x269   : > { %v867_v2 = vmul.f32 3.0, %v866_v15  ;;  %v921_v22 = vmul.f32 -0.5, %v866_v15  ;;  %v996_v59 = vsub.f32 %v3069_v12, %v866_v15  ;;  %v993_v19 = vsub.f32 %v3056_v49, %v866_v15 }
 0x26a   : > { %v994_v53 = vsub.f32 %v3060_v62, %v866_v15  ;;  %v995_v57 = vsub.f32 %v3066_v52, %v866_v15  ;;  %v942_v62 = vrot.slane %v920_v18, 2 }
 0x26b   : > { %v868_v13 = vmul.f32 %v867_v2, %v2564_v1  ;;  %v922_v14 = vmul.f32 %v921_v22, %v899_v35  ;;  %v1000_v34 = vmul.f32 %v996_v59, %v852_v33  ;;  %v997_v16 = vmul.f32 %v993_v19, %v3082_v21 }
 0x26c   : > { %v998_v31 = vmul.f32 %v994_v53, %v3084_v32  ;;  %v999_v12 = vmul.f32 %v995_v57, %v3086_v50  ;;  %v3574_v21 = vsub.f32 %v3004_v6, %v2996_v3  ;;  %v975_v50 = vrot.slane %v2707_v0, 1 }
 0x26d   : > { %v927_v49 = vmul.f32 -0.361, %v868_v13  ;;  %v1001_v47 = vmul.f32 -8.0, %v997_v16  ;;  %v1004_v15 = vmul.f32 -8.0, %v1000_v34  ;;  %v964_v2 = vmul.f32 %v1609_v30, %v922_v14 }
 0x26e   : > { %v1002_v51 = vmul.f32 -8.0, %v998_v31  ;;  %v1003_v52 = vmul.f32 -8.0, %v999_v12  ;;  %v986_v22 = vmul.f32 %v985_v39, %v929_v8  ;;  %v3578_v3 = vsub.f32 %v3004_v6, %v3002_v5 }
 0x26f   : > { %v931_v56 = vmul.f32 %v929_v8, %v927_v49  ;;  %v1009_v33 = vmul.f32 %v3574_v21, %v1001_v47  ;;  %v1028_v32 = vmul.f32 %v3575_v61, %v1001_v47  ;;  %v1012_v57 = vmul.f32 %v3579_v9, %v1004_v15 }
 0x270   : > { %v1010_v18 = vmul.f32 %v3576_v55, %v1002_v51  ;;  %v1029_v59 = vmul.f32 %v3577_v58, %v1002_v51  ;;  %v1011_v53 = vmul.f32 %v3578_v3, %v1003_v52  ;;  %v3580_v8 = vsub.f32 %v3012_v10, %v3018_v17 }
 0x271   : > { %v935_v19 = vmul.f32 %v933_v63, %v931_v56  ;;  %v973_v30 = vmul.f32 %v971_v20, %v931_v56  ;;  %v3581_v34 = vsub.f32 %v3012_v10, %v3021_v26  ;;  %v926_v39 = vmul.f32 %v924_v60, %v922_v14 }
 0x272   : > { %v1013_v13 = vadd.f32 %v1010_v18, %v1009_v33  ;;  %v1030_v4 = vmul.f32 %v3580_v8, %v1003_v52  ;;  %v1032_v16 = vadd.f32 %v1029_v59, %v1028_v32  ;;  %v965_v12 = vmul.f32 %v964_v2, %v924_v60 }
 0x273   : > { %v1031_v11 = vmul.f32 %v3581_v34, %v1004_v15  ;;  %v938_v31 = vrot.slane %v935_v19, 1  ;;  %v974_v49 = vmul.f32 %v973_v30, %v933_v63  ;;  %v983_v5 = vmul.f32 -0.5, %v899_v35 }
 0x274   : > { %v987_v20 = vmul.f32 %v986_v22, %v933_v63  ;;  %v1014_v47 = vadd.f32 %v1013_v13, %v1011_v53  ;;  %v1033_v51 = vadd.f32 %v1032_v16, %v1030_v4  ;;  %v1015_v56 = vsel %vm823_vm4, %v1012_v57, 0.0 }
 0x275   : > { %v940_v6 = vadd.f32 %v938_v31, %v926_v39  ;;  %v977_v7 = vmul.f32 %v975_v50, %v974_v49  ;;  %v1034_v17 = vsel %vm823_vm4, %v1031_v11, 0.0  ;;  %v3582_v10 = vrot.slane %v2707_v0, 2 }
 0x276   : > { %v1016_v52 = vadd.f32 %v1015_v56, %v1014_v47  ;;  %v1035_v21 = vadd.f32 %v1034_v17, %v1033_v51  ;;  %v984_v15 = vmul.f32 %v983_v5, %v924_v60  ;;  %v989_v2 = vrot.slane %v987_v20, 1 }
 0x277   : > { %v944_v33 = vmul.f32 %v942_v62, %v940_v6  ;;  %v966_v26 = vmul.f32 %v965_v12, %v3582_v10  ;;  %v979_v14 = vrot.slane %v977_v7, 1 }
 0x278   : > { %v1017_v61 = vrot.slane %v1016_v52, 4  ;;  %v1036_v35 = vrot.slane %v1035_v21, 4  ;;  %v991_v58 = vsub.f32 %v984_v15, %v989_v2 }
 0x279   : > { %v946_v63 = vrot.slane %v944_v33, 4  ;;  %v981_v32 = vadd.f32 %v979_v14, %v966_v26  ;;  %v1101_v14 = vld [vmem:[#allocation15] sm:$0x1] }
 0x27a   : > { %v1018_v22 = vadd.f32 %v1017_v61, %v1016_v52  ;;  %v1037_v55 = vadd.f32 %v1036_v35, %v1035_v21  ;;  %v992_v60 = vmul.f32 %v991_v58, %v942_v62  ;;  %v1097_v21 = vld [vmem:[#allocation14] sm:$0x7]  ;;  %v936_v61 = vld [vmem:[#allocation12] sm:$0x1] }
 0x27b   : > { %v948_v50 = vsel %vm823_vm4, %v946_v63, 0.0  ;;  %v982_v18 = vmul.f32 %v981_v32, %v942_v62  ;;  %vm3583_vm4 = vcmask 1042432  }
 0x27c   : > { %949 = vadd.xlane.f32.xlu0 %v948_v50  ;;  %v1019_v59 = vrot.slane %v1018_v22, 2  ;;  %v1038_v19 = vrot.slane %v1037_v55, 2  ;;  %vm3584_vm7 = vmmov %vm3583_vm4 }
 0x27d   : > { %v1044_v30 = vrot.slane %v982_v18, 6 }
 0x27e   : > { %v1020_v3 = vadd.f32 %v1019_v59, %v1018_v22  ;;  %v1039_v53 = vadd.f32 %v1038_v19, %v1037_v55 }
 0x27f   : > { %v1046_v9 = vmul.f32 %v1044_v30, %v2707_v0 }
 0x280   : > { %v1021_v57 = vrot.slane %v1020_v3, 1  ;;  %v1040_v13 = vrot.slane %v1039_v53, 1 }
 0x281   : > { %v1047_v4 = vperm.slane %v1046_v9, 6 }
 0x282   : > { %v1022_v8 = vadd.f32 %v1021_v57, %v1020_v3  ;;  %v1041_v34 = vadd.f32 %v1040_v13, %v1039_v53 }
 0x283   : > { %v1048_v39 = vmul.f32 %v1047_v4, %v2564_v1 }
 0x284   : > { %v1023_v11 = vmul.f32 %v1022_v8, %v992_v60  ;;  %v1042_v16 = vmul.f32 %v1041_v34, %v992_v60 }
 0x286   : > { %v1050_v31 = vrot.slane %v1023_v11, 1  ;;  %v1054_v12 = vrot.slane %v1042_v16, 1 }
 0x288   : > { %v1052_v49 = vsel %vm3583_vm4, %v1048_v39, %v1050_v31  ;;  %v1056_v5 = vsel %vm3584_vm7, %v1048_v39, %v1054_v12 }
 0x289   : > { %1073 = vmatmul.f32.vlgmr.msra.gmra.mxu2 %v1052_v49  ;;  %1093 = vmatmul.f32.vlgmr.msra.gmra.mxu3 %v1056_v5 }
 0x2ef   : > { %v950_v20 = vpop.xlane.xlu0 %949 }
 0x2f0   : > { %v951_v47 = vrot.slane %v950_v20, 4 }
 0x2f2   : > { %v952_v62 = vadd.f32 %v951_v47, %v950_v20 }
 0x2f4   : > { %v953_v51 = vrot.slane %v952_v62, 2 }
 0x2f6   : > { %v954_v6 = vadd.f32 %v953_v51, %v952_v62 }
 0x2f8   : > { %v955_v7 = vrot.slane %v954_v6, 1 }
 0x2fa   : > { %v956_v56 = vadd.f32 %v955_v7, %v954_v6 }
 0x2fc   : > { %1719 = vpush %v956_v56 }
 0x30c   : > { %v1074_v17 = vpop.f32.mrf.mxu2  ;;  %v1094_v52 = vpop.f32.mrf.mxu3 }
 0x30d   : > { %v1098_v33 = vsub.f32 %v1074_v17, %v1094_v52  ;;  %v1102_v10 = vadd.f32 %v1094_v52, %v1074_v17 }
 0x30f   : > { %v1099_v26 = vadd.f32 %v1098_v33, %v1097_v21  ;;  %1104 = vst [vmem:[#allocation1] sm:$0xff] %v1102_v10 }
 0x311   : > { %1100 = vst [vmem:[#allocation14] sm:$0x7] %v1099_v26 }
 0x316   : > { %v1106_v15 = vld [vmem:[#allocation1 + $0x3] ss:$9 sm:$0xff] }
 0x317   : > { %v1108_v2 = vadd.f32 %v1106_v15, %v1101_v14 }
 0x319   : > { %1109 = vst [vmem:[#allocation15] sm:$0x1] %v1108_v2 }
 0x32d   : > { %s1720_s16 = spop %1719 }
 0x32e   : > { %v958_v35 = vstv %s1720_s16 }
 0x32f   : > { %v959_v63 = vadd.f32 %v958_v35, %v936_v61 }
 0x331   : > { %960 = vst [vmem:[#allocation12] sm:$0x1] %v959_v63 }
 0x332 PF: > { %s3585_s5 = sld [smem:[#allocation27_spill]] }
 0x338   : > { %p1643_p13 = scmp.ne.s32.totalorder %s3585_s5, 2 }
 0x33a   : > { %1113 = sbr.rel (%p1643_p13) target bundleno = 1136 (0x470), region = 76 }
 0x33f   : > { %v2289_v32 = vmov 1.0   ;;  %v3166_v22 = vld [vmem:[%s2556_s27 + $0x1] ss:$0 sm:$0xff]  ;;  %vm3586_vm13 = vnez %v3533_v43  ;;  %vm3587_vm6 = vnez %v3531_v42  ;;  %vm3588_vm5 = vnez %v3529_v41  ;;  %v3602_v41 = vld [vmem:[#allocation42_spill] sm:$0xff]  ;;  %v3605_v43 = vld [vmem:[#allocation41_spill] sm:$0xff] }
 0x340   : > { %1661 = vmatpush.msk.msra.mxu0 %vm2696_vm1, %v2289_v32  ;;  %1677 = vmatpush.xpose.msk.msra.mxu1 %vm2696_vm1, %v2289_v32  ;;  %vm1131_vm11 = vcmp.eq.s32.totalorder %v2618_v29, %v3166_v22  ;;  %vm1130_vm1 = vcmp.eq.s32.totalorder %v2615_v28, %v3166_v22  ;;  %vm3589_vm9 = vnez %v3527_v40  ;;  %vm3590_vm12 = vnez %v3525_v38  ;;  %v3598_v28 = vld [vmem:[#allocation46_spill] sm:$0xff]  ;;  %v1204_v29 = vld [vmem:[#allocation15] sm:$0x1]  ;;  %v3603_v42 = vld [vmem:[#allocation44_spill] sm:$0xff] }
 0x341   : > { %1693 = vmatpush.xpose.msk.msra.mxu2 %vm1131_vm11, %v2289_v32  ;;  %vm3591_vm3 = vnez %v3523_v37  ;;  %vm3592_vm2 = vnez %v3521_v36  ;;  %vm1126_vm8 = vcmp.eq.s32.totalorder %v2603_v23, %v3166_v22  ;;  %vm3599_vm11 = vnez %v3598_v28  ;;  %v3600_v23 = vld [vmem:[#allocation45_spill] sm:$0xff]  ;;  %v3606_v40 = vld [vmem:[#allocation40_spill] sm:$0xff]  ;;  %v3607_v38 = vld [vmem:[#allocation39_spill] sm:$0xff] }
 0x342   : > { %1662 = vmatpush.msk.msra.mxu0 %vm2691_vm0, %v2289_v32  ;;  %v3608_v37 = vld [vmem:[#allocation38_spill] sm:$0xff]  ;;  %v3609_v36 = vld [vmem:[#allocation37_spill] sm:$0xff]  ;;  %v1168_v44 = vrot.slane %v2707_v0, 3  ;;  %v3610_v57 = vld [vmem:[#allocation36_spill] sm:$0xff]  ;;  %v2290_v11 = vmov 0.0   ;;  %v1197_v31 = vsub.f32 0.0, %v2564_v1 }
 0x343   : > { %v3612_v4 = vld [vmem:[#allocation35_spill] sm:$0xff]  ;;  %v3613_v34 = vld [vmem:[#allocation34_spill] sm:$0xff]  ;;  %v1275_v14 = vld [vmem:[#allocation14] sm:$0x7] }
 0x344   : > { %1663 = vmatpush.msk.msra.mxu0 %vm2686_vm15, %v2289_v32  ;;  %1678 = vmatpush.xpose.msk.msra.mxu1 %vm2691_vm0, %v2289_v32  ;;  %vm1129_vm0 = vcmp.eq.s32.totalorder %v2612_v27, %v3166_v22  ;;  %v3597_v27 = vld [vmem:[#allocation43_spill] sm:$0xff]  ;;  %v1170_v45 = vmul.f32 %v1168_v44, %v2564_v1  ;;  %v1198_v49 = vmul.f32 %v1197_v31, %v1168_v44 }
 0x345   : > { %1694 = vmatpush.xpose.msk.msra.mxu2 %vm1130_vm1, %v2289_v32  ;;  %vm1125_vm7 = vcmp.eq.s32.totalorder %v3597_v27, %v3166_v22  ;;  %vm3601_vm1 = vnez %v3600_v23 }
 0x346   : > { %1664 = vmatpush.msk.msra.mxu0 %vm2681_vm14, %v2289_v32  ;;  %v1660_v46 = vadd.f32 -1.0, %v1170_v45  ;;  %v1199_v20 = vmul.f32 %v1198_v49, %v1168_v44 }
 0x348   : > { %1665 = vmatpush.msk.msra.mxu0 %vm3586_vm13, %v2289_v32  ;;  %1679 = vmatpush.xpose.msk.msra.mxu1 %vm2686_vm15, %v2289_v32  ;;  %vm1128_vm15 = vcmp.eq.s32.totalorder %v2609_v25, %v3166_v22  ;;  %v3593_v25 = vld [vmem:[#allocation48_spill] sm:$0xff]  ;;  %v1172_v48 = vmul.f32 -16.0, %v1660_v46  ;;  %v1201_v62 = vrot.slane %v1199_v20, 5 }
 0x349   : > { %1695 = vmatpush.xpose.msk.msra.mxu2 %vm1129_vm0, %v2289_v32  ;;  %vm3594_vm10 = vnez %v3593_v25  ;;  %vm3604_vm0 = vnez %v3603_v42 }
 0x34a   : > { %1666 = vmatpush.msk.msra.mxu0 %vm3587_vm6, %v2289_v32  ;;  %v1173_v55 = vmul.f32 1.442695, %v1172_v48 }
 0x34c   : > { %1667 = vmatpush.msk.msra.mxu0 %vm3588_vm5, %v2289_v32  ;;  %1680 = vmatpush.xpose.msk.msra.mxu1 %vm2681_vm14, %v2289_v32  ;;  %vm1127_vm14 = vcmp.eq.s32.totalorder %v2606_v24, %v3166_v22  ;;  %v3595_v24 = vld [vmem:[#allocation47_spill] sm:$0xff]  ;;  %1899 = vpow2.f32 %v1173_v55 }
 0x34d   : > { %1696 = vmatpush.xpose.msk.msra.mxu2 %vm1128_vm15, %v2289_v32  ;;  %vm3596_vm4 = vnez %v3595_v24  ;;  %vm1121_vm15 = vcmp.eq.s32.totalorder %v3607_v38, %v3166_v22 }
 0x34e   : > { %1668 = vmatpush.msk.msra.mxu0 %vm3589_vm9, %v2289_v32 }
 0x350   : > { %1669 = vmatpush.msk.msra.mxu0 %vm3590_vm12, %v2289_v32  ;;  %1681 = vmatpush.xpose.msk.msra.mxu1 %vm3586_vm13, %v2289_v32  ;;  %vm1124_vm13 = vcmp.eq.s32.totalorder %v3602_v41, %v3166_v22 }
 0x351   : > { %1697 = vmatpush.xpose.msk.msra.mxu2 %vm1127_vm14, %v2289_v32 }
 0x352   : > { %1670 = vmatpush.msk.msra.mxu0 %vm3591_vm3, %v2289_v32  ;;  %v1900_v50 = vpop.eup %1899 }
 0x353   : > { %v1175_v18 = vadd.f32 1.0, %v1900_v50 }
 0x354   : > { %1671 = vmatpush.msk.msra.mxu0 %vm3592_vm2, %v2289_v32  ;;  %1682 = vmatpush.xpose.msk.msra.mxu1 %vm3587_vm6, %v2289_v32  ;;  %vm1123_vm6 = vcmp.eq.s32.totalorder %v3605_v43, %v3166_v22 }
 0x355   : > { %1698 = vmatpush.xpose.msk.msra.mxu2 %vm1126_vm8, %v2289_v32  ;;  %v1177_v58 = vrot.slane %v1175_v18, 5  ;;  %vm1164_vm8 = vcmp.le.f32.partialorder %v2700_v54, 21.167088 }
 0x356   : > { %1672 = vmatpush.msk.msra.mxu0 %vm3594_vm10, %v2289_v32 }
 0x357   : > { %1901 = vrcp.f32 %v1177_v58  ;;  %vm1184_vm14 = vweird.f32 %v1177_v58  ;;  %v1190_v53 = vand.u32 2147483648, %v1177_v58  ;;  %v1188_v60 = vand.u32 2147483647, %v1177_v58 }
 0x358   : > { %1673 = vmatpush.msk.msra.mxu0 %vm3596_vm4, %v2289_v32  ;;  %1683 = vmatpush.xpose.msk.msra.mxu1 %vm3588_vm5, %v2289_v32  ;;  %vm1122_vm5 = vcmp.eq.s32.totalorder %v3606_v40, %v3166_v22 }
 0x359   : > { %1699 = vmatpush.xpose.msk.msra.mxu2 %vm1125_vm7, %v2289_v32  ;;  %v1191_v13 = vor.u32 1.1754944e-38, %v1190_v53 }
 0x35a   : > { %1674 = vmatpush.msk.msra.mxu0 %vm3599_vm11, %v2289_v32 }
 0x35c   : > { %1675 = vmatpush.msk.msra.mxu0 %vm3601_vm1, %v2289_v32  ;;  %1684 = vmatpush.xpose.msk.msra.mxu1 %vm3589_vm9, %v2289_v32  ;;  %vm1120_vm9 = vcmp.eq.s32.totalorder %v3608_v37, %v3166_v22 }
 0x35d   : > { %1700 = vmatpush.xpose.msk.msra.mxu2 %vm1124_vm13, %v2289_v32  ;;  %v1902_v59 = vpop.eup %1901  ;;  %vm1116_vm13 = vcmp.eq.s32.totalorder %v3613_v34, %v3166_v22 }
 0x35e   : > { %1676 = vmatpush.msk.msra.mxu0 %vm3604_vm0, %v2289_v32  ;;  %v1180_v19 = vmul.f32 %v1902_v59, %v1177_v58 }
 0x35f   : > { %1221 = vmatmul.f32.vlgmr.msra.gmra.mxu0 %v1204_v29 }
 0x360   : > { %1685 = vmatpush.xpose.msk.msra.mxu1 %vm3590_vm12, %v2289_v32  ;;  %vm1119_vm12 = vcmp.eq.s32.totalorder %v3609_v36, %v3166_v22  ;;  %v1181_v30 = vsub.f32 1.0, %v1180_v19 }
 0x361   : > { %1701 = vmatpush.xpose.msk.msra.mxu2 %vm1123_vm6, %v2289_v32 }
 0x362   : > { %v1182_v3 = vmul.f32 %v1902_v59, %v1181_v30 }
 0x364   : > { %1686 = vmatpush.xpose.msk.msra.mxu1 %vm3591_vm3, %v2289_v32  ;;  %vm1185_vm3 = vweird.f32 %v1902_v59  ;;  %v1183_v9 = vadd.f32 %v1902_v59, %v1182_v3 }
 0x365   : > { %1702 = vmatpush.xpose.msk.msra.mxu2 %vm1122_vm5, %v2289_v32 }
 0x368   : > { %1687 = vmatpush.xpose.msk.msra.mxu1 %vm3592_vm2, %v2289_v32  ;;  %vm1118_vm2 = vcmp.eq.s32.totalorder %v3610_v57, %v3166_v22 }
 0x369   : > { %1703 = vmatpush.xpose.msk.msra.mxu2 %vm1121_vm15, %v2289_v32 }
 0x36c   : > { %1688 = vmatpush.xpose.msk.msra.mxu1 %vm3594_vm10, %v2289_v32  ;;  %vm1186_vm10 = vmor %vm1184_vm14, %vm1185_vm3 }
 0x36d   : > { %1704 = vmatpush.xpose.msk.msra.mxu2 %vm1120_vm9, %v2289_v32  ;;  %v1187_v8 = vsel %vm1186_vm10, %v1902_v59, %v1183_v9 }
 0x370   : > { %1689 = vmatpush.xpose.msk.msra.mxu1 %vm3596_vm4, %v2289_v32  ;;  %vm3611_vm4 = vcmp.gt.f32.partialorder %v2564_v1, 0.0 }
 0x371   : > { %1705 = vmatpush.xpose.msk.msra.mxu2 %vm1119_vm12, %v2289_v32  ;;  %vm1165_vm7 = vmand %vm1164_vm8, %vm3611_vm4 }
 0x372   : > { %v1166_v16 = vsel %vm1165_vm7, 1.0, %v2290_v11 }
 0x374   : > { %1690 = vmatpush.xpose.msk.msra.mxu1 %vm3599_vm11, %v2289_v32  ;;  %vm1189_vm11 = vcmp.eq.f32.partialorder %v1188_v60, 8.507059e+37 }
 0x375   : > { %1706 = vmatpush.xpose.msk.msra.mxu2 %vm1118_vm2, %v2289_v32  ;;  %v1192_v54 = vsel %vm1189_vm11, %v1191_v13, %v1187_v8 }
 0x376   : > { %v1193_v39 = vmul.f32 %v1192_v54, %v1166_v16 }
 0x378   : > { %1691 = vmatpush.xpose.msk.msra.mxu1 %vm3601_vm1, %v2289_v32  ;;  %vm1117_vm1 = vcmp.eq.s32.totalorder %v3612_v4, %v3166_v22  ;;  %v1194_v12 = vsub.f32 1.0, %v1193_v39 }
 0x379   : > { %1707 = vmatpush.xpose.msk.msra.mxu2 %vm1117_vm1, %v2289_v32 }
 0x37a   : > { %v1195_v5 = vmul.f32 %v1194_v12, %v1193_v39 }
 0x37c   : > { %1692 = vmatpush.xpose.msk.msra.mxu1 %vm3604_vm0, %v2289_v32  ;;  %v1196_v47 = vmul.f32 16.0, %v1195_v5 }
 0x37d   : > { %1708 = vmatpush.xpose.msk.msra.mxu2 %vm1116_vm13, %v2289_v32 }
 0x37e   : > { %v1203_v51 = vmul.f32 %v1201_v62, %v1196_v47 }
 0x380   : > { %v1226_v6 = vrot.slane %v1203_v51, 6 }
 0x3dc   : > { %v1222_v7 = vpop.f32.mrf.mxu0 }
 0x3dd   : > { %v1228_v56 = vmul.f32 %v1226_v6, %v1222_v7 }
 0x3df   : > { %v1230_v17 = vrot.slane %v1228_v56, 2 }
 0x3e1   : > { %v1232_v52 = vmul.f32 %v1230_v17, %v2707_v0 }
 0x3e3   : > { %v1233_v21 = vperm.slane %v1232_v52, 6 }
 0x3e5   : > { %v1234_v33 = vmul.f32 %v1233_v21, %v2564_v1 }
 0x3e7   : > { %1251 = vmatmul.f32.vlgmr.msra.gmra.mxu1 %v1234_v33  ;;  %1271 = vmatmul.f32.vlgmr.msra.gmra.mxu2 %v1234_v33 }
 0x464   : > { %v1252_v10 = vpop.f32.mrf.mxu1 }
 0x46a   : > { %v1272_v26 = vpop.f32.mrf.mxu2 }
 0x46b   : > { %v1276_v15 = vsub.f32 %v1252_v10, %v1272_v26 }
 0x46d   : > { %v1277_v2 = vadd.f32 %v1276_v15, %v1275_v14 }
 0x46f   : > { %1278 = vst [vmem:[#allocation14] sm:$0x7] %v1277_v2 }
 0x470 PF: > { %p1764_p0 = scmp.eq.s32.totalorder %s2471_s20, 14  ;;  %s2291_s8 = smov [#allocation12]  }
 0x471   : > { %s1297_s26 = sshll.u32 %s2291_s8, 4  ;;  %s3614_s23 = sld [smem:[#allocation54_spill]]  ;;  %s1298_s26 = int_to_ptr.vmem [resolvable:$true] %s1297_s26 }
 0x472   : > { %s2292_s10 = smov [#allocation11]   ;;  %s3615_s0 = sld [smem:[#allocation53_spill]] }
 0x473   : > { %s1285_s25 = sshll.u32 %s2292_s10, 4  ;;  %s3616_s14 = sld [smem:[#allocation55_spill]]  ;;  %s1286_s25 = int_to_ptr.vmem [resolvable:$true] %s1285_s25 }
 0x474   : > { %s2293_s17 = smov [#allocation14]   ;;  %s2294_s22 = smov [#allocation15]  }
 0x475   : > { %s1309_s19 = sshll.u32 %s2293_s17, 4  ;;  %s1321_s27 = sshll.u32 %s2294_s22, 4  ;;  %s1310_s19 = int_to_ptr.vmem [resolvable:$true] %s1309_s19  ;;  %s1322_s27 = int_to_ptr.vmem [resolvable:$true] %s1321_s27 }
 0x476   : > { %s3617_s21 = sld [smem:[#allocation56_spill]] }
 0x477   : > { %s1299_s3 = sshll.u32 %s3614_s23, 4  ;;  %s1300_s3 = int_to_ptr.hbm [resolvable:$true] %s1299_s3 }
 0x478   : > { %1734 = dma.vmem_to_hbm [thread:$0]  (%p1764_p0), %s1298_s26, 16, %s1300_s3, [#allocation13]  }
 0x479   : > { %s1287_s29 = sshll.u32 %s3615_s0, 4  ;;  %s1311_s7 = sshll.u32 %s3616_s14, 4  ;;  %s1288_s29 = int_to_ptr.hbm [resolvable:$true] %s1287_s29  ;;  %s1312_s7 = int_to_ptr.hbm [resolvable:$true] %s1311_s7 }
 0x47a   : > { %1732 = dma.vmem_to_hbm [thread:$0]  (%p1764_p0), %s1286_s25, 16, %s1288_s29, [#allocation4]  }
 0x47b   : > { %1736 = dma.vmem_to_hbm [thread:$0]  (%p1764_p0), %s1310_s19, 64, %s1312_s7, [#allocation13]  }
 0x47c   : > { %s1323_s30 = sshll.u32 %s3617_s21, 4  ;;  %s1324_s30 = int_to_ptr.hbm [resolvable:$true] %s1323_s30 }
 0x47d   : > { %1738 = dma.vmem_to_hbm [thread:$0]  (%p1764_p0), %s1322_s27, 16, %s1324_s30, [#allocation16]  }
 0x47e   : > { %2226 = dma.done.wait (%p1764_p0), [#allocation4], 16  }
 0x47f   : > { %2228 = vsyncadd (%p1764_p0), [#allocation4], 4294967280 }
 0x480   : > { %2230 = dma.done.wait (%p1764_p0), [#allocation13], 80  }
 0x481   : > { %2232 = vsyncadd (%p1764_p0), [#allocation13], 4294967216 }
 0x482   : > { %2234 = dma.done.wait (%p1764_p0), [#allocation16], 16  }
 0x483   : > { %2236 = vsyncadd (%p1764_p0), [#allocation16], 4294967280 }
 0x484 PF: > { %s3618_s16 = sld [smem:[#allocation29_spill]]  ;;  %s3626_s27 = smov %s2243_s28 }
 0x485   : > { %s3619_s5 = sld [smem:[#allocation24_spill]]  ;;  %s3628_s30 = smov %s2255_s9 }
 0x486   : > { %s3620_s29 = sld [smem:[#allocation32_spill]]  ;;  %s3630_s11 = smov %s2271_s13 }
 0x487   : > { %s3621_s8 = sld [smem:[#allocation25_spill]] }
 0x488   : > { %s3622_s10 = sld [smem:[#allocation33_spill]] }
 0x489   : > { %s3623_s12 = sld [smem:[#allocation28_spill]] }
 0x48a   : > { %s31_s15 = sadd.s32 1, %s3618_s16   ;;  %s3624_s26 = sld [smem:[#allocation30_spill]] }
 0x48b   : > { %p28_p2 = scmp.ge.s32.totalorder %s31_s15, 17   ;;  %s3625_s14 = sld [smem:[#allocation31_spill]] }
 0x48c   : > { %s3627_s28 = smov %s3619_s5 }
 0x48d   : > { %s3629_s9 = smov %s3621_s8  ;;  %30 = sbr.rel (!%p28_p2) target bundleno = 23 (0x17), region = 166 }
 0x490   : > { %s3631_s13 = smov %s3624_s26 }
 0x492   :  { %1352 = vsyncpa [#allocation3], 1 }
 0x493   :  { %1354 = vsyncpa [#allocation3 + $0x1], 1 }
 0x494   :  { %1355 = vsyncpa [#allocation6], 1 }
 0x495   :  { %1357 = vsyncpa [#allocation6 + $0x1], 1 }
 0x496   :  { %1358 = vsyncpa [#allocation9], 1 }
 0x497   :  { %1360 = vsyncpa [#allocation9 + $0x1], 1 }
 0x498   :  { %1361 = vsyncpa [#allocation4], 1 }
 0x499   :  { %1363 = vsyncpa [#allocation4 + $0x1], 1 }
 0x49a   :  { %1364 = vsyncpa [#allocation13], 1 }
 0x49b   :  { %1365 = vsyncpa [#allocation16], 1 }

</bundles_post_ra>
